<compile_context>
chip_gen: v6e
topology: v6e:2x2x1
jax: 0.10.0
libtpu: 0.0.40
codegen_flags: <defaults>
</compile_context>

<pallas_src>
import functools

import numpy as np

import jax
import jax.numpy as jnp
from jax.experimental import pallas as pl
from jax.experimental.pallas import tpu as pltpu


OFFSETS = ((0, 0), (0, 1), (1, 0), (1, 1))   # (dh, dw) order for all 2x2 kernels


# -----------------------------------------------------------------------------
# The single fused Pallas kernel
# -----------------------------------------------------------------------------

def _acmodel_fused_kernel(x0_ref, g1_ref, p1_ref, g2_ref, g3_ref, gs_ref,
                          w1_ref, b1_ref, w2_ref, b2_ref, w3_ref, b3_ref,
                          wh_ref, bh_ref, wa2_ref, ba2_ref, wc2_ref, bc2_ref,
                          logp_ref, val_ref):
    f32 = jnp.float32

    def gather(sel_ref, x):
        # sel_ref: (K, rows_out, rows_in) constant 0/1 matrices; returns K gathers.
        return [jnp.dot(sel_ref[k], x, preferred_element_type=f32)
                for k in range(sel_ref.shape[0])]

    def conv_relu(x, sel_ref, w_ref, b_ref):
        # 2x2 VALID conv as im2col (4 shifted row-gathers, concat on lanes) + matmul.
        patches = jnp.concatenate(gather(sel_ref, x), axis=1)
        y = jnp.dot(patches, w_ref[...], preferred_element_type=f32) + b_ref[...]
        return jnp.maximum(y, 0.0)

    x0 = x0_ref[...]                                      # (B*H*W, 7) channels-last

    # Stage 1: merged static/target/agent Conv2d(k=2) + ReLU
    y1 = conv_relu(x0, g1_ref, w1_ref, b1_ref)            # (B*H1*W1, 24)

    # MaxPool2d(2, 2): max of the four stride-2 row selections
    p = gather(p1_ref, y1)
    y1 = jnp.maximum(jnp.maximum(p[0], p[1]), jnp.maximum(p[2], p[3]))   # (B*Hp*Wp, 24)

    # Stage 2: merged Conv2d(8->16) x3 + ReLU
    y2 = conv_relu(y1, g2_ref, w2_ref, b2_ref)            # (B*H3*W3, 48)

    # Stage 3: merged target_post Conv2d(32->32) + agent Conv2d(16->32) + ReLU
    y3 = conv_relu(y2, g3_ref, w3_ref, b3_ref)            # (B*H4*W4, 64)

    # Features: per-spatial-position row selections, concat -> (B, S4*64)
    feats = jnp.concatenate(gather(gs_ref, y3), axis=1)

    # Fused actor/critic hidden layer: one lane-dense N=128 matmul + tanh
    h = jnp.tanh(jnp.dot(feats, wh_ref[...], preferred_element_type=f32)
                 + bh_ref[...])                           # (B, 128)
    nh = wh_ref.shape[1] // 2
    ha = h[:, :nh]
    hc = h[:, nh:]

    # Actor logits -> log_softmax
    logits = jnp.dot(ha, wa2_ref[...], preferred_element_type=f32) + ba2_ref[...]
    m = jnp.max(logits, axis=1, keepdims=True)
    lse = jnp.log(jnp.sum(jnp.exp(logits - m), axis=1, keepdims=True)) + m
    logp_ref[...] = logits - lse

    # Critic value
    val_ref[...] = jnp.dot(hc, wc2_ref[...], preferred_element_type=f32) + bc2_ref[...]


# -----------------------------------------------------------------------------
# Parameter init (matches the PyTorch module's init)
# -----------------------------------------------------------------------------

def _feature_spatial(H, W):
    h1, w1 = H - 1, W - 1          # conv k=2
    h2, w2 = h1 // 2, w1 // 2      # maxpool 2x2
    h3, w3 = h2 - 1, w2 - 1        # conv k=2
    h4, w4 = h3 - 1, w3 - 1        # conv k=2 (target_post / agent conv3)
    return h4, w4


def _conv_params(key, cout, cin, k=2):
    kw_, kb_ = jax.random.split(key)
    fan_in = cin * k * k
    bound = 1.0 / (fan_in ** 0.5)
    w = jax.random.uniform(kw_, (cout, cin, k, k), jnp.float32, -bound, bound)
    b = jax.random.uniform(kb_, (cout,), jnp.float32, -bound, bound)
    return w, b


def _linear_params(key, in_f, out_f):
    # init_params: normal(0,1), rows normalized to unit L2 norm; bias = 0.
    w = jax.random.normal(key, (out_f, in_f), jnp.float32)
    w = w / jnp.sqrt(jnp.sum(w ** 2, axis=1, keepdims=True))
    return w.T, jnp.zeros((out_f,), jnp.float32)   # stored (in, out) for x @ W


def init_acmodel_params(key, input_shape, num_actions):
    H, W, _C = input_shape
    h, w = _feature_spatial(H, W)
    feat_size = 64 * h * w
    keys = jax.random.split(key, 12)
    p = {}
    p["static_w1"], p["static_b1"] = _conv_params(keys[0], 8, 5)
    p["static_w2"], p["static_b2"] = _conv_params(keys[1], 16, 8)
    p["tpre_w1"], p["tpre_b1"] = _conv_params(keys[2], 8, 1)
    p["tpre_w2"], p["tpre_b2"] = _conv_params(keys[3], 16, 8)
    p["tpost_w"], p["tpost_b"] = _conv_params(keys[4], 32, 32)
    p["apre_w1"], p["apre_b1"] = _conv_params(keys[5], 8, 1)
    p["apre_w2"], p["apre_b2"] = _conv_params(keys[6], 16, 8)
    p["apre_w3"], p["apre_b3"] = _conv_params(keys[7], 32, 16)
    p["actor_w1"], p["actor_b1"] = _linear_params(keys[8], feat_size, 64)
    p["actor_w2"], p["actor_b2"] = _linear_params(keys[9], 64, num_actions)
    p["critic_w1"], p["critic_b1"] = _linear_params(keys[10], feat_size, 64)
    p["critic_w2"], p["critic_b2"] = _linear_params(keys[11], 64, 1)
    return p


# -----------------------------------------------------------------------------
# One-time packing: merged block-diagonal conv weights + selection matrices
# -----------------------------------------------------------------------------

def _sel_matrix(B, Hi, Wi, Ho, Wo, dh, dw, stride):
    """0/1 matrix mapping out-row (b, i, j) <- in-row (b, i*stride+dh, j*stride+dw)."""
    M = np.zeros((B * Ho * Wo, B * Hi * Wi), np.float32)
    for b in range(B):
        for i in range(Ho):
            for j in range(Wo):
                r = (b * Ho + i) * Wo + j
                c = (b * Hi + i * stride + dh) * Wi + (j * stride + dw)
                M[r, c] = 1.0
    return M


def _stack_sel(B, Hi, Wi, Ho, Wo, stride):
    return jnp.asarray(np.stack(
        [_sel_matrix(B, Hi, Wi, Ho, Wo, dh, dw, stride) for dh, dw in OFFSETS]))


def _head_sel(B, S):
    M = np.zeros((S, B, B * S), np.float32)
    for s in range(S):
        for b in range(B):
            M[s, b, b * S + s] = 1.0
    return jnp.asarray(M)


def pack_acmodel_params(p, input_shape, batch_size):
    H, W, _C = input_shape
    B = batch_size
    H1, W1 = H - 1, W - 1
    Hp, Wp = H1 // 2, W1 // 2
    H3, W3 = Hp - 1, Wp - 1
    H4, W4 = H3 - 1, W3 - 1
    S4 = H4 * W4

    packed = {}
    # --- selection matrices (spatial rearrangement as matmuls) ---
    packed["g1"] = _stack_sel(B, H, W, H1, W1, stride=1)    # conv1 patches
    packed["p1"] = _stack_sel(B, H1, W1, Hp, Wp, stride=2)  # maxpool 2x2
    packed["g2"] = _stack_sel(B, Hp, Wp, H3, W3, stride=1)  # conv2 patches
    packed["g3"] = _stack_sel(B, H3, W3, H4, W4, stride=1)  # conv3 patches
    packed["gs"] = _head_sel(B, S4)                         # feature flatten

    # --- stage 1: Conv2d(5->8), Conv2d(1->8), Conv2d(1->8), merged (28, 24) ---
    blocks = []
    for dh, dw in OFFSETS:
        blk = jnp.zeros((7, 24), jnp.float32)
        blk = blk.at[0:5, 0:8].set(p["static_w1"][:, :, dh, dw].T)
        blk = blk.at[5, 8:16].set(p["tpre_w1"][:, 0, dh, dw])
        blk = blk.at[6, 16:24].set(p["apre_w1"][:, 0, dh, dw])
        blocks.append(blk)
    packed["w1"] = jnp.concatenate(blocks, axis=0)
    packed["b1"] = jnp.concatenate(
        [p["static_b1"], p["tpre_b1"], p["apre_b1"]]).reshape(1, 24)

    # --- stage 2: 3x Conv2d(8->16), merged (96, 48) ---
    blocks = []
    for dh, dw in OFFSETS:
        blk = jnp.zeros((24, 48), jnp.float32)
        blk = blk.at[0:8, 0:16].set(p["static_w2"][:, :, dh, dw].T)
        blk = blk.at[8:16, 16:32].set(p["tpre_w2"][:, :, dh, dw].T)
        blk = blk.at[16:24, 32:48].set(p["apre_w2"][:, :, dh, dw].T)
        blocks.append(blk)
    packed["w2"] = jnp.concatenate(blocks, axis=0)
    packed["b2"] = jnp.concatenate(
        [p["static_b2"], p["tpre_b2"], p["apre_b2"]]).reshape(1, 48)

    # --- stage 3: Conv2d(32->32) target_post + Conv2d(16->32) agent, merged (192, 64) ---
    blocks = []
    for dh, dw in OFFSETS:
        blk = jnp.zeros((48, 64), jnp.float32)
        blk = blk.at[0:32, 0:32].set(p["tpost_w"][:, :, dh, dw].T)
        blk = blk.at[32:48, 32:64].set(p["apre_w3"][:, :, dh, dw].T)
        blocks.append(blk)
    packed["w3"] = jnp.concatenate(blocks, axis=0)
    packed["b3"] = jnp.concatenate([p["tpost_b"], p["apre_b3"]]).reshape(1, 64)

    # --- head: fuse actor/critic first Linear into one (S4*64, 128) matmul ---
    # kernel features are ordered [spatial-major, channel-minor]; torch flatten is
    # channel-major, so permute the weight rows once here.
    perm = np.array([(r % 64) * S4 + (r // 64) for r in range(S4 * 64)])
    packed["wh"] = jnp.concatenate(
        [p["actor_w1"][perm, :], p["critic_w1"][perm, :]], axis=1)
    packed["bh"] = jnp.concatenate([p["actor_b1"], p["critic_b1"]]).reshape(1, -1)
    packed["wa2"] = p["actor_w2"]
    packed["ba2"] = p["actor_b2"].reshape(1, -1)
    packed["wc2"] = p["critic_w2"]
    packed["bc2"] = p["critic_b2"].reshape(1, 1)
    return packed


# -----------------------------------------------------------------------------
# Forward (single pallas_call)
# -----------------------------------------------------------------------------

def _estimate_cost(args, B, num_actions):
    (x0, g1, p1, g2, g3, gs, w1, b1, w2, b2, w3, b3,
     wh, bh, wa2, ba2, wc2, bc2) = args

    def mm(m, k, n):
        return 2 * m * k * n

    M0, Cin = x0.shape
    M1, Mp, M2, M3 = g1.shape[1], p1.shape[1], g2.shape[1], g3.shape[1]
    flops = 0
    flops += 4 * mm(M1, M0, Cin) + mm(M1, w1.shape[0], w1.shape[1])
    flops += 4 * mm(Mp, M1, w1.shape[1])
    flops += 4 * mm(M2, Mp, w2.shape[0] // 4) + mm(M2, w2.shape[0], w2.shape[1])
    flops += 4 * mm(M3, M2, w3.shape[0] // 4) + mm(M3, w3.shape[0], w3.shape[1])
    flops += gs.shape[0] * mm(B, M3, w3.shape[1]) + mm(B, wh.shape[0], wh.shape[1])
    flops += mm(B, wa2.shape[0], wa2.shape[1]) + mm(B, wc2.shape[0], wc2.shape[1])
    transc = B * wh.shape[1] + B * num_actions + B
    bytes_accessed = sum(int(a.size) * 4 for a in args) + B * (num_actions + 1) * 4
    return flops, transc, bytes_accessed


def acmodel_forward(packed, image, num_actions):
    """image: (B, H, W, 7) float32 (NHWC, like obs.image).
    Returns (log_probs (B, num_actions), value (B,))."""
    B, H, W, C = image.shape
    x0 = image.reshape(B * H * W, C)     # channels-last row matrix; free view in XLA

    args = (x0, packed["g1"], packed["p1"], packed["g2"], packed["g3"], packed["gs"],
            packed["w1"], packed["b1"], packed["w2"], packed["b2"],
            packed["w3"], packed["b3"], packed["wh"], packed["bh"],
            packed["wa2"], packed["ba2"], packed["wc2"], packed["bc2"])

    flops, transc, bytes_accessed = _estimate_cost(args, B, num_actions)
    vmem = pl.BlockSpec(memory_space=pltpu.MemorySpace.VMEM)

    logp, value = pl.pallas_call(
        _acmodel_fused_kernel,
        out_shape=(jax.ShapeDtypeStruct((B, num_actions), jnp.float32),
                   jax.ShapeDtypeStruct((B, 1), jnp.float32)),
        in_specs=[vmem] * len(args),
        out_specs=(vmem, vmem),
        cost_estimate=pl.CostEstimate(flops=flops, transcendentals=transc,
                                      bytes_accessed=bytes_accessed),
    )(*args)
    # TODO(synk): torch.distributions.Categorical has no Pallas equivalent; we
    # return its defining log-probabilities instead.
    return logp, value[:, 0]


# -----------------------------------------------------------------------------
# Pure-JAX reference (mirrors the PyTorch module) for correctness checking
# -----------------------------------------------------------------------------

def acmodel_reference(p, image, num_actions):
    hi = jax.lax.Precision.HIGHEST
    x = jnp.transpose(image, (0, 3, 1, 2))

    def conv(x, w, b):
        y = jax.lax.conv_general_dilated(
            x, w, (1, 1), "VALID",
            dimension_numbers=("NCHW", "OIHW", "NCHW"), precision=hi)
        return jax.nn.relu(y + b[None, :, None, None])

    def pool(x):
        return jax.lax.reduce_window(x, -jnp.inf, jax.lax.max,
                                     (1, 1, 2, 2), (1, 1, 2, 2), "VALID")

    s = conv(x[:, :5], p["static_w1"], p["static_b1"])
    s = pool(s)
    s = conv(s, p["static_w2"], p["static_b2"])
    t = conv(x[:, 5:6], p["tpre_w1"], p["tpre_b1"])
    t = pool(t)
    t = conv(t, p["tpre_w2"], p["tpre_b2"])
    t = conv(jnp.concatenate([s, t], axis=1), p["tpost_w"], p["tpost_b"])
    a = conv(x[:, 6:7], p["apre_w1"], p["apre_b1"])
    a = pool(a)
    a = conv(a, p["apre_w2"], p["apre_b2"])
    a = conv(a, p["apre_w3"], p["apre_b3"])
    feat = jnp.concatenate([t, a], axis=1).reshape(image.shape[0], -1)

    ha = jnp.tanh(jnp.dot(feat, p["actor_w1"], precision=hi) + p["actor_b1"])
    logits = jnp.dot(ha, p["actor_w2"], precision=hi) + p["actor_b2"]
    logp = jax.nn.log_softmax(logits, axis=1)
    hc = jnp.tanh(jnp.dot(feat, p["critic_w1"], precision=hi) + p["critic_b1"])
    value = (jnp.dot(hc, p["critic_w2"], precision=hi) + p["critic_b2"])[:, 0]
    return logp, value


# -----------------------------------------------------------------------------
# Main
# -----------------------------------------------------------------------------

if __name__ == "__main__":
    B = 2
    H = W = 9
    C = 7                      # 5 static + 1 target + 1 agent channel
    num_actions = 6
    input_shape = (H, W, C)

    key = jax.random.PRNGKey(0)
    pkey, xkey = jax.random.split(key)
    params = init_acmodel_params(pkey, input_shape, num_actions)
    packed = pack_acmodel_params(params, input_shape, batch_size=B)
    image = jax.random.uniform(xkey, (B, H, W, C), dtype=jnp.float32)

    fwd = jax.jit(functools.partial(acmodel_forward, num_actions=num_actions))
    logp, value = fwd(packed, image)
    jax.block_until_ready((logp, value))

    # shape / sanity checks
    assert logp.shape == (B, num_actions), logp.shape
    assert value.shape == (B,), value.shape
    assert bool(jnp.all(jnp.isfinite(logp))) and bool(jnp.all(jnp.isfinite(value)))
    assert bool(jnp.allclose(jnp.sum(jnp.exp(logp), axis=1), 1.0, atol=1e-4))

    # compare against the pure-JAX reference of the original module
    logp_ref, value_ref = acmodel_reference(params, image, num_actions)
    assert bool(jnp.allclose(logp, logp_ref, atol=5e-2, rtol=5e-2)), "logp mismatch"
    assert bool(jnp.allclose(value, value_ref, atol=5e-2, rtol=5e-2)), "value mismatch"

    print("KERNEL_OK")
</pallas_src>

<mosaic_0001>
module attributes {stable_mosaic.version = 11 : i64} {
  func.func @_acmodel_fused_kernel(%arg0: memref<162x7xf32, #tpu.memory_space<vmem>>, %arg1: memref<4x128x162xf32, #tpu.memory_space<vmem>>, %arg2: memref<4x32x128xf32, #tpu.memory_space<vmem>>, %arg3: memref<4x18x32xf32, #tpu.memory_space<vmem>>, %arg4: memref<4x8x18xf32, #tpu.memory_space<vmem>>, %arg5: memref<4x2x8xf32, #tpu.memory_space<vmem>>, %arg6: memref<28x24xf32, #tpu.memory_space<vmem>>, %arg7: memref<1x24xf32, #tpu.memory_space<vmem>>, %arg8: memref<96x48xf32, #tpu.memory_space<vmem>>, %arg9: memref<1x48xf32, #tpu.memory_space<vmem>>, %arg10: memref<192x64xf32, #tpu.memory_space<vmem>>, %arg11: memref<1x64xf32, #tpu.memory_space<vmem>>, %arg12: memref<256x128xf32, #tpu.memory_space<vmem>>, %arg13: memref<1x128xf32, #tpu.memory_space<vmem>>, %arg14: memref<64x6xf32, #tpu.memory_space<vmem>>, %arg15: memref<1x6xf32, #tpu.memory_space<vmem>>, %arg16: memref<64x1xf32, #tpu.memory_space<vmem>>, %arg17: memref<1x1xf32, #tpu.memory_space<vmem>>, %arg18: memref<2x6xf32, #tpu.memory_space<vmem>>, %arg19: memref<2x1xf32, #tpu.memory_space<vmem>>) attributes {dimension_semantics = [], scalar_prefetch = 0 : i64, scratch_operands = 0 : i64, tpu.core_type = #tpu.core_type<tc>} {
    %c0 = arith.constant 0 : index
    %c0_0 = arith.constant 0 : index
    %0 = vector.load %arg0[%c0, %c0_0] : memref<162x7xf32, #tpu.memory_space<vmem>>, vector<162x7xf32>
    %c0_1 = arith.constant 0 : index
    %c0_2 = arith.constant 0 : index
    %c0_3 = arith.constant 0 : index
    %1 = vector.load %arg1[%c0_1, %c0_2, %c0_3] : memref<4x128x162xf32, #tpu.memory_space<vmem>>, vector<1x128x162xf32>
    %2 = vector.shape_cast %1 : vector<1x128x162xf32> to vector<128x162xf32>
    %cst = arith.constant dense<0.000000e+00> : vector<128x7xf32>
    %3 = tpu.matmul %2, %0, %cst {dimension_numbers = #tpu.dot_dimension_numbers<[1], [0], [0], [1], [0, 0, 1, 1], [], []>} : vector<128x162xf32>, vector<162x7xf32>, vector<128x7xf32> -> vector<128x7xf32>
    %c1 = arith.constant 1 : index
    %c0_4 = arith.constant 0 : index
    %c0_5 = arith.constant 0 : index
    %4 = vector.load %arg1[%c1, %c0_4, %c0_5] : memref<4x128x162xf32, #tpu.memory_space<vmem>>, vector<1x128x162xf32>
    %5 = vector.shape_cast %4 : vector<1x128x162xf32> to vector<128x162xf32>
    %cst_6 = arith.constant dense<0.000000e+00> : vector<128x7xf32>
    %6 = tpu.matmul %5, %0, %cst_6 {dimension_numbers = #tpu.dot_dimension_numbers<[1], [0], [0], [1], [0, 0, 1, 1], [], []>} : vector<128x162xf32>, vector<162x7xf32>, vector<128x7xf32> -> vector<128x7xf32>
    %c2 = arith.constant 2 : index
    %c0_7 = arith.constant 0 : index
    %c0_8 = arith.constant 0 : index
    %7 = vector.load %arg1[%c2, %c0_7, %c0_8] : memref<4x128x162xf32, #tpu.memory_space<vmem>>, vector<1x128x162xf32>
    %8 = vector.shape_cast %7 : vector<1x128x162xf32> to vector<128x162xf32>
    %cst_9 = arith.constant dense<0.000000e+00> : vector<128x7xf32>
    %9 = tpu.matmul %8, %0, %cst_9 {dimension_numbers = #tpu.dot_dimension_numbers<[1], [0], [0], [1], [0, 0, 1, 1], [], []>} : vector<128x162xf32>, vector<162x7xf32>, vector<128x7xf32> -> vector<128x7xf32>
    %c3 = arith.constant 3 : index
    %c0_10 = arith.constant 0 : index
    %c0_11 = arith.constant 0 : index
    %10 = vector.load %arg1[%c3, %c0_10, %c0_11] : memref<4x128x162xf32, #tpu.memory_space<vmem>>, vector<1x128x162xf32>
    %11 = vector.shape_cast %10 : vector<1x128x162xf32> to vector<128x162xf32>
    %cst_12 = arith.constant dense<0.000000e+00> : vector<128x7xf32>
    %12 = tpu.matmul %11, %0, %cst_12 {dimension_numbers = #tpu.dot_dimension_numbers<[1], [0], [0], [1], [0, 0, 1, 1], [], []>} : vector<128x162xf32>, vector<162x7xf32>, vector<128x7xf32> -> vector<128x7xf32>
    %13 = tpu.concatenate %3, %6, %9, %12 in 1 : vector<128x7xf32>, vector<128x7xf32>, vector<128x7xf32>, vector<128x7xf32> -> vector<128x28xf32>
    %c0_13 = arith.constant 0 : index
    %c0_14 = arith.constant 0 : index
    %14 = vector.load %arg6[%c0_13, %c0_14] : memref<28x24xf32, #tpu.memory_space<vmem>>, vector<28x24xf32>
    %cst_15 = arith.constant dense<0.000000e+00> : vector<128x24xf32>
    %15 = tpu.matmul %13, %14, %cst_15 {dimension_numbers = #tpu.dot_dimension_numbers<[1], [0], [0], [1], [0, 0, 1, 1], [], []>} : vector<128x28xf32>, vector<28x24xf32>, vector<128x24xf32> -> vector<128x24xf32>
    %c0_16 = arith.constant 0 : index
    %c0_17 = arith.constant 0 : index
    %16 = vector.load %arg7[%c0_16, %c0_17] : memref<1x24xf32, #tpu.memory_space<vmem>>, vector<1x24xf32>
    %17 = vector.broadcast %16 : vector<1x24xf32> to vector<128x24xf32>
    %18 = arith.addf %15, %17 : vector<128x24xf32>
    %cst_18 = arith.constant 0.000000e+00 : f32
    %19 = vector.broadcast %cst_18 : f32 to vector<128x24xf32>
    %20 = arith.maximumf %18, %19 : vector<128x24xf32>
    %c0_19 = arith.constant 0 : index
    %c0_20 = arith.constant 0 : index
    %c0_21 = arith.constant 0 : index
    %21 = vector.load %arg2[%c0_19, %c0_20, %c0_21] : memref<4x32x128xf32, #tpu.memory_space<vmem>>, vector<1x32x128xf32>
    %22 = vector.shape_cast %21 : vector<1x32x128xf32> to vector<32x128xf32>
    %cst_22 = arith.constant dense<0.000000e+00> : vector<32x24xf32>
    %23 = tpu.matmul %22, %20, %cst_22 {dimension_numbers = #tpu.dot_dimension_numbers<[1], [0], [0], [1], [0, 0, 1, 1], [], []>} : vector<32x128xf32>, vector<128x24xf32>, vector<32x24xf32> -> vector<32x24xf32>
    %c1_23 = arith.constant 1 : index
    %c0_24 = arith.constant 0 : index
    %c0_25 = arith.constant 0 : index
    %24 = vector.load %arg2[%c1_23, %c0_24, %c0_25] : memref<4x32x128xf32, #tpu.memory_space<vmem>>, vector<1x32x128xf32>
    %25 = vector.shape_cast %24 : vector<1x32x128xf32> to vector<32x128xf32>
    %cst_26 = arith.constant dense<0.000000e+00> : vector<32x24xf32>
    %26 = tpu.matmul %25, %20, %cst_26 {dimension_numbers = #tpu.dot_dimension_numbers<[1], [0], [0], [1], [0, 0, 1, 1], [], []>} : vector<32x128xf32>, vector<128x24xf32>, vector<32x24xf32> -> vector<32x24xf32>
    %c2_27 = arith.constant 2 : index
    %c0_28 = arith.constant 0 : index
    %c0_29 = arith.constant 0 : index
    %27 = vector.load %arg2[%c2_27, %c0_28, %c0_29] : memref<4x32x128xf32, #tpu.memory_space<vmem>>, vector<1x32x128xf32>
    %28 = vector.shape_cast %27 : vector<1x32x128xf32> to vector<32x128xf32>
    %cst_30 = arith.constant dense<0.000000e+00> : vector<32x24xf32>
    %29 = tpu.matmul %28, %20, %cst_30 {dimension_numbers = #tpu.dot_dimension_numbers<[1], [0], [0], [1], [0, 0, 1, 1], [], []>} : vector<32x128xf32>, vector<128x24xf32>, vector<32x24xf32> -> vector<32x24xf32>
    %c3_31 = arith.constant 3 : index
    %c0_32 = arith.constant 0 : index
    %c0_33 = arith.constant 0 : index
    %30 = vector.load %arg2[%c3_31, %c0_32, %c0_33] : memref<4x32x128xf32, #tpu.memory_space<vmem>>, vector<1x32x128xf32>
    %31 = vector.shape_cast %30 : vector<1x32x128xf32> to vector<32x128xf32>
    %cst_34 = arith.constant dense<0.000000e+00> : vector<32x24xf32>
    %32 = tpu.matmul %31, %20, %cst_34 {dimension_numbers = #tpu.dot_dimension_numbers<[1], [0], [0], [1], [0, 0, 1, 1], [], []>} : vector<32x128xf32>, vector<128x24xf32>, vector<32x24xf32> -> vector<32x24xf32>
    %33 = arith.maximumf %23, %26 : vector<32x24xf32>
    %34 = arith.maximumf %29, %32 : vector<32x24xf32>
    %35 = arith.maximumf %33, %34 : vector<32x24xf32>
    %c0_35 = arith.constant 0 : index
    %c0_36 = arith.constant 0 : index
    %c0_37 = arith.constant 0 : index
    %36 = vector.load %arg3[%c0_35, %c0_36, %c0_37] : memref<4x18x32xf32, #tpu.memory_space<vmem>>, vector<1x18x32xf32>
    %37 = vector.shape_cast %36 : vector<1x18x32xf32> to vector<18x32xf32>
    %cst_38 = arith.constant dense<0.000000e+00> : vector<18x24xf32>
    %38 = tpu.matmul %37, %35, %cst_38 {dimension_numbers = #tpu.dot_dimension_numbers<[1], [0], [0], [1], [0, 0, 1, 1], [], []>} : vector<18x32xf32>, vector<32x24xf32>, vector<18x24xf32> -> vector<18x24xf32>
    %c1_39 = arith.constant 1 : index
    %c0_40 = arith.constant 0 : index
    %c0_41 = arith.constant 0 : index
    %39 = vector.load %arg3[%c1_39, %c0_40, %c0_41] : memref<4x18x32xf32, #tpu.memory_space<vmem>>, vector<1x18x32xf32>
    %40 = vector.shape_cast %39 : vector<1x18x32xf32> to vector<18x32xf32>
    %cst_42 = arith.constant dense<0.000000e+00> : vector<18x24xf32>
    %41 = tpu.matmul %40, %35, %cst_42 {dimension_numbers = #tpu.dot_dimension_numbers<[1], [0], [0], [1], [0, 0, 1, 1], [], []>} : vector<18x32xf32>, vector<32x24xf32>, vector<18x24xf32> -> vector<18x24xf32>
    %c2_43 = arith.constant 2 : index
    %c0_44 = arith.constant 0 : index
    %c0_45 = arith.constant 0 : index
    %42 = vector.load %arg3[%c2_43, %c0_44, %c0_45] : memref<4x18x32xf32, #tpu.memory_space<vmem>>, vector<1x18x32xf32>
    %43 = vector.shape_cast %42 : vector<1x18x32xf32> to vector<18x32xf32>
    %cst_46 = arith.constant dense<0.000000e+00> : vector<18x24xf32>
    %44 = tpu.matmul %43, %35, %cst_46 {dimension_numbers = #tpu.dot_dimension_numbers<[1], [0], [0], [1], [0, 0, 1, 1], [], []>} : vector<18x32xf32>, vector<32x24xf32>, vector<18x24xf32> -> vector<18x24xf32>
    %c3_47 = arith.constant 3 : index
    %c0_48 = arith.constant 0 : index
    %c0_49 = arith.constant 0 : index
    %45 = vector.load %arg3[%c3_47, %c0_48, %c0_49] : memref<4x18x32xf32, #tpu.memory_space<vmem>>, vector<1x18x32xf32>
    %46 = vector.shape_cast %45 : vector<1x18x32xf32> to vector<18x32xf32>
    %cst_50 = arith.constant dense<0.000000e+00> : vector<18x24xf32>
    %47 = tpu.matmul %46, %35, %cst_50 {dimension_numbers = #tpu.dot_dimension_numbers<[1], [0], [0], [1], [0, 0, 1, 1], [], []>} : vector<18x32xf32>, vector<32x24xf32>, vector<18x24xf32> -> vector<18x24xf32>
    %48 = tpu.concatenate %38, %41, %44, %47 in 1 : vector<18x24xf32>, vector<18x24xf32>, vector<18x24xf32>, vector<18x24xf32> -> vector<18x96xf32>
    %c0_51 = arith.constant 0 : index
    %c0_52 = arith.constant 0 : index
    %49 = vector.load %arg8[%c0_51, %c0_52] : memref<96x48xf32, #tpu.memory_space<vmem>>, vector<96x48xf32>
    %cst_53 = arith.constant dense<0.000000e+00> : vector<18x48xf32>
    %50 = tpu.matmul %48, %49, %cst_53 {dimension_numbers = #tpu.dot_dimension_numbers<[1], [0], [0], [1], [0, 0, 1, 1], [], []>} : vector<18x96xf32>, vector<96x48xf32>, vector<18x48xf32> -> vector<18x48xf32>
    %c0_54 = arith.constant 0 : index
    %c0_55 = arith.constant 0 : index
    %51 = vector.load %arg9[%c0_54, %c0_55] : memref<1x48xf32, #tpu.memory_space<vmem>>, vector<1x48xf32>
    %52 = vector.broadcast %51 : vector<1x48xf32> to vector<18x48xf32>
    %53 = arith.addf %50, %52 : vector<18x48xf32>
    %cst_56 = arith.constant 0.000000e+00 : f32
    %54 = vector.broadcast %cst_56 : f32 to vector<18x48xf32>
    %55 = arith.maximumf %53, %54 : vector<18x48xf32>
    %c0_57 = arith.constant 0 : index
    %c0_58 = arith.constant 0 : index
    %c0_59 = arith.constant 0 : index
    %56 = vector.load %arg4[%c0_57, %c0_58, %c0_59] : memref<4x8x18xf32, #tpu.memory_space<vmem>>, vector<1x8x18xf32>
    %57 = vector.shape_cast %56 : vector<1x8x18xf32> to vector<8x18xf32>
    %cst_60 = arith.constant dense<0.000000e+00> : vector<8x48xf32>
    %58 = tpu.matmul %57, %55, %cst_60 {dimension_numbers = #tpu.dot_dimension_numbers<[1], [0], [0], [1], [0, 0, 1, 1], [], []>} : vector<8x18xf32>, vector<18x48xf32>, vector<8x48xf32> -> vector<8x48xf32>
    %c1_61 = arith.constant 1 : index
    %c0_62 = arith.constant 0 : index
    %c0_63 = arith.constant 0 : index
    %59 = vector.load %arg4[%c1_61, %c0_62, %c0_63] : memref<4x8x18xf32, #tpu.memory_space<vmem>>, vector<1x8x18xf32>
    %60 = vector.shape_cast %59 : vector<1x8x18xf32> to vector<8x18xf32>
    %cst_64 = arith.constant dense<0.000000e+00> : vector<8x48xf32>
    %61 = tpu.matmul %60, %55, %cst_64 {dimension_numbers = #tpu.dot_dimension_numbers<[1], [0], [0], [1], [0, 0, 1, 1], [], []>} : vector<8x18xf32>, vector<18x48xf32>, vector<8x48xf32> -> vector<8x48xf32>
    %c2_65 = arith.constant 2 : index
    %c0_66 = arith.constant 0 : index
    %c0_67 = arith.constant 0 : index
    %62 = vector.load %arg4[%c2_65, %c0_66, %c0_67] : memref<4x8x18xf32, #tpu.memory_space<vmem>>, vector<1x8x18xf32>
    %63 = vector.shape_cast %62 : vector<1x8x18xf32> to vector<8x18xf32>
    %cst_68 = arith.constant dense<0.000000e+00> : vector<8x48xf32>
    %64 = tpu.matmul %63, %55, %cst_68 {dimension_numbers = #tpu.dot_dimension_numbers<[1], [0], [0], [1], [0, 0, 1, 1], [], []>} : vector<8x18xf32>, vector<18x48xf32>, vector<8x48xf32> -> vector<8x48xf32>
    %c3_69 = arith.constant 3 : index
    %c0_70 = arith.constant 0 : index
    %c0_71 = arith.constant 0 : index
    %65 = vector.load %arg4[%c3_69, %c0_70, %c0_71] : memref<4x8x18xf32, #tpu.memory_space<vmem>>, vector<1x8x18xf32>
    %66 = vector.shape_cast %65 : vector<1x8x18xf32> to vector<8x18xf32>
    %cst_72 = arith.constant dense<0.000000e+00> : vector<8x48xf32>
    %67 = tpu.matmul %66, %55, %cst_72 {dimension_numbers = #tpu.dot_dimension_numbers<[1], [0], [0], [1], [0, 0, 1, 1], [], []>} : vector<8x18xf32>, vector<18x48xf32>, vector<8x48xf32> -> vector<8x48xf32>
    %68 = tpu.concatenate %58, %61, %64, %67 in 1 : vector<8x48xf32>, vector<8x48xf32>, vector<8x48xf32>, vector<8x48xf32> -> vector<8x192xf32>
    %c0_73 = arith.constant 0 : index
    %c0_74 = arith.constant 0 : index
    %69 = vector.load %arg10[%c0_73, %c0_74] : memref<192x64xf32, #tpu.memory_space<vmem>>, vector<192x64xf32>
    %cst_75 = arith.constant dense<0.000000e+00> : vector<8x64xf32>
    %70 = tpu.matmul %68, %69, %cst_75 {dimension_numbers = #tpu.dot_dimension_numbers<[1], [0], [0], [1], [0, 0, 1, 1], [], []>} : vector<8x192xf32>, vector<192x64xf32>, vector<8x64xf32> -> vector<8x64xf32>
    %c0_76 = arith.constant 0 : index
    %c0_77 = arith.constant 0 : index
    %71 = vector.load %arg11[%c0_76, %c0_77] : memref<1x64xf32, #tpu.memory_space<vmem>>, vector<1x64xf32>
    %72 = vector.broadcast %71 : vector<1x64xf32> to vector<8x64xf32>
    %73 = arith.addf %70, %72 : vector<8x64xf32>
    %cst_78 = arith.constant 0.000000e+00 : f32
    %74 = vector.broadcast %cst_78 : f32 to vector<8x64xf32>
    %75 = arith.maximumf %73, %74 : vector<8x64xf32>
    %c0_79 = arith.constant 0 : index
    %c0_80 = arith.constant 0 : index
    %c0_81 = arith.constant 0 : index
    %76 = vector.load %arg5[%c0_79, %c0_80, %c0_81] : memref<4x2x8xf32, #tpu.memory_space<vmem>>, vector<1x2x8xf32>
    %77 = vector.shape_cast %76 : vector<1x2x8xf32> to vector<2x8xf32>
    %cst_82 = arith.constant dense<0.000000e+00> : vector<2x64xf32>
    %78 = tpu.matmul %77, %75, %cst_82 {dimension_numbers = #tpu.dot_dimension_numbers<[1], [0], [0], [1], [0, 0, 1, 1], [], []>} : vector<2x8xf32>, vector<8x64xf32>, vector<2x64xf32> -> vector<2x64xf32>
    %c1_83 = arith.constant 1 : index
    %c0_84 = arith.constant 0 : index
    %c0_85 = arith.constant 0 : index
    %79 = vector.load %arg5[%c1_83, %c0_84, %c0_85] : memref<4x2x8xf32, #tpu.memory_space<vmem>>, vector<1x2x8xf32>
    %80 = vector.shape_cast %79 : vector<1x2x8xf32> to vector<2x8xf32>
    %cst_86 = arith.constant dense<0.000000e+00> : vector<2x64xf32>
    %81 = tpu.matmul %80, %75, %cst_86 {dimension_numbers = #tpu.dot_dimension_numbers<[1], [0], [0], [1], [0, 0, 1, 1], [], []>} : vector<2x8xf32>, vector<8x64xf32>, vector<2x64xf32> -> vector<2x64xf32>
    %c2_87 = arith.constant 2 : index
    %c0_88 = arith.constant 0 : index
    %c0_89 = arith.constant 0 : index
    %82 = vector.load %arg5[%c2_87, %c0_88, %c0_89] : memref<4x2x8xf32, #tpu.memory_space<vmem>>, vector<1x2x8xf32>
    %83 = vector.shape_cast %82 : vector<1x2x8xf32> to vector<2x8xf32>
    %cst_90 = arith.constant dense<0.000000e+00> : vector<2x64xf32>
    %84 = tpu.matmul %83, %75, %cst_90 {dimension_numbers = #tpu.dot_dimension_numbers<[1], [0], [0], [1], [0, 0, 1, 1], [], []>} : vector<2x8xf32>, vector<8x64xf32>, vector<2x64xf32> -> vector<2x64xf32>
    %c3_91 = arith.constant 3 : index
    %c0_92 = arith.constant 0 : index
    %c0_93 = arith.constant 0 : index
    %85 = vector.load %arg5[%c3_91, %c0_92, %c0_93] : memref<4x2x8xf32, #tpu.memory_space<vmem>>, vector<1x2x8xf32>
    %86 = vector.shape_cast %85 : vector<1x2x8xf32> to vector<2x8xf32>
    %cst_94 = arith.constant dense<0.000000e+00> : vector<2x64xf32>
    %87 = tpu.matmul %86, %75, %cst_94 {dimension_numbers = #tpu.dot_dimension_numbers<[1], [0], [0], [1], [0, 0, 1, 1], [], []>} : vector<2x8xf32>, vector<8x64xf32>, vector<2x64xf32> -> vector<2x64xf32>
    %88 = tpu.concatenate %78, %81, %84, %87 in 1 : vector<2x64xf32>, vector<2x64xf32>, vector<2x64xf32>, vector<2x64xf32> -> vector<2x256xf32>
    %c0_95 = arith.constant 0 : index
    %c0_96 = arith.constant 0 : index
    %89 = vector.load %arg12[%c0_95, %c0_96] : memref<256x128xf32, #tpu.memory_space<vmem>>, vector<256x128xf32>
    %cst_97 = arith.constant dense<0.000000e+00> : vector<2x128xf32>
    %90 = tpu.matmul %88, %89, %cst_97 {dimension_numbers = #tpu.dot_dimension_numbers<[1], [0], [0], [1], [0, 0, 1, 1], [], []>} : vector<2x256xf32>, vector<256x128xf32>, vector<2x128xf32> -> vector<2x128xf32>
    %c0_98 = arith.constant 0 : index
    %c0_99 = arith.constant 0 : index
    %91 = vector.load %arg13[%c0_98, %c0_99] : memref<1x128xf32, #tpu.memory_space<vmem>>, vector<1x128xf32>
    %92 = vector.broadcast %91 : vector<1x128xf32> to vector<2x128xf32>
    %93 = arith.addf %90, %92 : vector<2x128xf32>
    %94 = math.tanh %93 : vector<2x128xf32>
    %95 = vector.extract_strided_slice %94 {offsets = [0, 0], sizes = [2, 64], strides = [1, 1]} : vector<2x128xf32> to vector<2x64xf32>
    %96 = vector.extract_strided_slice %94 {offsets = [0, 64], sizes = [2, 64], strides = [1, 1]} : vector<2x128xf32> to vector<2x64xf32>
    %c0_100 = arith.constant 0 : index
    %c0_101 = arith.constant 0 : index
    %97 = vector.load %arg14[%c0_100, %c0_101] : memref<64x6xf32, #tpu.memory_space<vmem>>, vector<64x6xf32>
    %cst_102 = arith.constant dense<0.000000e+00> : vector<2x6xf32>
    %98 = tpu.matmul %95, %97, %cst_102 {dimension_numbers = #tpu.dot_dimension_numbers<[1], [0], [0], [1], [0, 0, 1, 1], [], []>} : vector<2x64xf32>, vector<64x6xf32>, vector<2x6xf32> -> vector<2x6xf32>
    %c0_103 = arith.constant 0 : index
    %c0_104 = arith.constant 0 : index
    %99 = vector.load %arg15[%c0_103, %c0_104] : memref<1x6xf32, #tpu.memory_space<vmem>>, vector<1x6xf32>
    %100 = vector.broadcast %99 : vector<1x6xf32> to vector<2x6xf32>
    %101 = arith.addf %98, %100 : vector<2x6xf32>
    %cst_105 = arith.constant dense<0xFF800000> : vector<2xf32>
    %102 = vector.multi_reduction <maximumf>, %101, %cst_105 [1] : vector<2x6xf32> to vector<2xf32>
    %103 = vector.shape_cast %102 : vector<2xf32> to vector<2x1xf32>
    %104 = vector.broadcast %103 : vector<2x1xf32> to vector<2x6xf32>
    %105 = arith.subf %101, %104 : vector<2x6xf32>
    %106 = math.exp %105 : vector<2x6xf32>
    %cst_106 = arith.constant dense<0.000000e+00> : vector<2xf32>
    %107 = vector.multi_reduction <add>, %106, %cst_106 [1] : vector<2x6xf32> to vector<2xf32>
    %108 = vector.shape_cast %107 : vector<2xf32> to vector<2x1xf32>
    %109 = math.log %108 : vector<2x1xf32>
    %110 = arith.addf %109, %103 : vector<2x1xf32>
    %111 = vector.broadcast %110 : vector<2x1xf32> to vector<2x6xf32>
    %112 = arith.subf %101, %111 : vector<2x6xf32>
    %c0_107 = arith.constant 0 : index
    %c0_108 = arith.constant 0 : index
    %113 = vector.load %arg18[%c0_107, %c0_108] : memref<2x6xf32, #tpu.memory_space<vmem>>, vector<2x6xf32>
    tpu.vector_store %arg18[%c0_107, %c0_108], %112 {strides = array<i32>} : memref<2x6xf32, #tpu.memory_space<vmem>>, vector<2x6xf32>,
    %c0_109 = arith.constant 0 : index
    %c0_110 = arith.constant 0 : index
    %114 = vector.load %arg16[%c0_109, %c0_110] : memref<64x1xf32, #tpu.memory_space<vmem>>, vector<64x1xf32>
    %cst_111 = arith.constant dense<0.000000e+00> : vector<2x1xf32>
    %115 = tpu.matmul %96, %114, %cst_111 {dimension_numbers = #tpu.dot_dimension_numbers<[1], [0], [0], [1], [0, 0, 1, 1], [], []>} : vector<2x64xf32>, vector<64x1xf32>, vector<2x1xf32> -> vector<2x1xf32>
    %c0_112 = arith.constant 0 : index
    %c0_113 = arith.constant 0 : index
    %116 = vector.load %arg17[%c0_112, %c0_113] : memref<1x1xf32, #tpu.memory_space<vmem>>, vector<1x1xf32>
    %117 = vector.broadcast %116 : vector<1x1xf32> to vector<2x1xf32>
    %118 = arith.addf %115, %117 : vector<2x1xf32>
    %c0_114 = arith.constant 0 : index
    %c0_115 = arith.constant 0 : index
    %119 = vector.load %arg19[%c0_114, %c0_115] : memref<2x1xf32, #tpu.memory_space<vmem>>, vector<2x1xf32>
    tpu.vector_store %arg19[%c0_114, %c0_115], %118 {strides = array<i32>} : memref<2x1xf32, #tpu.memory_space<vmem>>, vector<2x1xf32>,
    return
  }
}

</mosaic_0001>

<bundles_post_ra>
// kernel: acmodel_forward.1
= control target key start
LH: loop header
LB: loop body
LE: loop exit
PB: predicated region body
PF: predicated region fallthrough
CT: control target
= control target key end

     0   :  { %s6108_s0 = inlined_call_operand.vmem [shape: f32[162,7], index: 0, kind: input, shape index: {}]   ;;  %s6109_s1 = inlined_call_operand.vmem [shape: f32[4,128,162], index: 1, kind: input, shape index: {}]   ;;  %s6110_s2 = inlined_call_operand.vmem [shape: f32[4,32,128], index: 2, kind: input, shape index: {}]   ;;  %s6111_s3 = inlined_call_operand.vmem [shape: f32[4,18,32], index: 3, kind: input, shape index: {}]   ;;  %s6112_s4 = inlined_call_operand.vmem [shape: f32[4,8,18], index: 4, kind: input, shape index: {}]   ;;  %s6113_s5 = inlined_call_operand.vmem [shape: f32[4,2,8], index: 5, kind: input, shape index: {}]   ;;  %s6114_s6 = inlined_call_operand.vmem [shape: f32[28,24], index: 6, kind: input, shape index: {}]   ;;  %s6115_s7 = inlined_call_operand.vmem [shape: f32[1,24], index: 7, kind: input, shape index: {}]   ;;  %s6116_s8 = inlined_call_operand.vmem [shape: f32[96,48], index: 8, kind: input, shape index: {}]   ;;  %s6117_s9 = inlined_call_operand.vmem [shape: f32[1,48], index: 9, kind: input, shape index: {}]   ;;  %s6118_s10 = inlined_call_operand.vmem [shape: f32[192,64], index: 10, kind: input, shape index: {}]   ;;  %s6119_s11 = inlined_call_operand.vmem [shape: f32[1,64], index: 11, kind: input, shape index: {}]   ;;  %s6120_s12 = inlined_call_operand.vmem [shape: f32[256,128], index: 12, kind: input, shape index: {}]   ;;  %s6121_s13 = inlined_call_operand.vmem [shape: f32[1,128], index: 13, kind: input, shape index: {}]   ;;  %s6122_s14 = inlined_call_operand.vmem [shape: f32[64,6], index: 14, kind: input, shape index: {}]   ;;  %s6123_s15 = inlined_call_operand.vmem [shape: f32[1,6], index: 15, kind: input, shape index: {}]   ;;  %s6124_s16 = inlined_call_operand.vmem [shape: f32[64,1], index: 16, kind: input, shape index: {}]   ;;  %s6125_s17 = inlined_call_operand.<no memory space> [shape: f32[1,1], index: 17, kind: input, shape index: {}]   ;;  %s6126_s18 = inlined_call_operand.hbm [shape: f32[2,6], index: 18, kind: output, shape index: {0}]   ;;  %s6127_s19 = inlined_call_operand.vmem [shape: f32[2,1], index: 19, kind: output, shape index: {1}]  }
   0x1   :  { %6132 = sst [smem:[#allocation6_spill]] %s6108_s0  ;;  %v25_v0 = vstv %s6125_s17 }
   0x2   :  { %6133 = sst [smem:[#allocation7_spill]] %s6109_s1  ;;  %26 = vst [vmem:[#allocation2] sm:$0x1] %v25_v0 }
   0x3   :  { %6134 = sst [smem:[#allocation8_spill]] %s6110_s2 }
   0x4   :  { %6135 = sst [smem:[#allocation9_spill]] %s6111_s3 }
   0x5   :  { %s6136_s1 = sld [smem:[#allocation6_spill]]  ;;  %v4309_v2 = vmov 0.0   ;;  %vm166_vm0 = vcmask 1041408   ;;  %vm117_vm1 = vcmask 277504  }
   0x6   :  { %170 = vmatprep.subr.mxu0 %v4309_v2  ;;  %396 = vmatprep.subr.mxu1 %v4309_v2  ;;  %s6137_s30 = sld [smem:[#allocation7_spill]] }
   0xb   :  { %v4427_v1 = vld [vmem:[%s6136_s1 + $0x78] sm:$0xff]  ;;  %v4434_v3 = vld [vmem:[%s6136_s1 + $0x70] sm:$0xff]  ;;  %v4443_v4 = vld [vmem:[%s6136_s1 + $0x68] sm:$0xff] }
   0xc   :  { %171 = vmatpush1.msra.mxu0 %v4427_v1  ;;  %397 = vmatpush1.msra.mxu1 %v4427_v1  ;;  %v4452_v5 = vld [vmem:[%s6136_s1 + $0x60] sm:$0xff]  ;;  %v4461_v6 = vld [vmem:[%s6136_s1 + $0x58] sm:$0xff]  ;;  %v4470_v7 = vld [vmem:[%s6136_s1 + $0x50] sm:$0xff] }
   0xd   :  { %172 = vmatprep.subr.mxu0 %v4309_v2  ;;  %398 = vmatprep.subr.mxu1 %v4309_v2  ;;  %v4479_v8 = vld [vmem:[%s6136_s1 + $0x48] sm:$0xff]  ;;  %v4488_v9 = vld [vmem:[%s6136_s1 + $0x40] sm:$0xff]  ;;  %v4497_v10 = vld [vmem:[%s6136_s1 + $0x38] sm:$0xff] }
   0xe   :  { %173 = vmatpush1.msra.mxu0 %v4434_v3  ;;  %399 = vmatpush1.msra.mxu1 %v4434_v3  ;;  %v4506_v11 = vld [vmem:[%s6136_s1 + $0x30] sm:$0xff]  ;;  %v4515_v12 = vld [vmem:[%s6136_s1 + $0x28] sm:$0xff]  ;;  %v4524_v13 = vld [vmem:[%s6136_s1 + $0x20] sm:$0xff] }
   0xf   :  { %174 = vmatprep.subr.mxu0 %v4309_v2  ;;  %400 = vmatprep.subr.mxu1 %v4309_v2  ;;  %v4533_v14 = vld [vmem:[%s6136_s1 + $0x18] sm:$0xff]  ;;  %v4542_v15 = vld [vmem:[%s6136_s1 + $0x10] sm:$0xff]  ;;  %v4551_v16 = vld [vmem:[%s6136_s1 + $0x8] sm:$0xff] }
  0x10   :  { %175 = vmatpush1.msra.mxu0 %v4443_v4  ;;  %401 = vmatpush1.msra.mxu1 %v4443_v4  ;;  %v4560_v17 = vld [vmem:[%s6136_s1] sm:$0xff]  ;;  %v4578_v19 = vld [vmem:[%s6136_s1 + $0x98] sm:$0xff]  ;;  %v4589_v20 = vld [vmem:[%s6136_s1 + $0x90] sm:$0xff] }
  0x11   :  { %176 = vmatprep.subr.mxu0 %v4309_v2  ;;  %402 = vmatprep.subr.mxu1 %v4309_v2  ;;  %v4569_v18 = vld [vmem:[%s6136_s1 + $0xa0] sm:$0x3]  ;;  %v4598_v21 = vld [vmem:[%s6136_s1 + $0x88] sm:$0xff]  ;;  %v88_v27 = vld [vmem:[%s6137_s30 + $0x18] sm:$0xff] }
  0x12   :  { %177 = vmatpush1.msra.mxu0 %v4452_v5  ;;  %403 = vmatpush1.msra.mxu1 %v4452_v5  ;;  %v4607_v22 = vld [vmem:[%s6136_s1 + $0x80] sm:$0xff]  ;;  %v86_v23 = vld [vmem:[%s6137_s30 + $0x8] sm:$0xff]  ;;  %v3441_v28 = vld [vmem:[%s6137_s30 + $0x118] sm:$0xff] }
  0x13   :  { %178 = vmatprep.subr.mxu0 %v4309_v2  ;;  %404 = vmatprep.subr.mxu1 %v4309_v2  ;;  %v3439_v24 = vld [vmem:[%s6137_s30 + $0x108] sm:$0xff]  ;;  %v85_v25 = vld [vmem:[%s6137_s30] sm:$0xff]  ;;  %v87_v29 = vld [vmem:[%s6137_s30 + $0x10] sm:$0xff] }
  0x14   :  { %179 = vmatpush1.msra.mxu0 %v4461_v6  ;;  %405 = vmatpush1.msra.mxu1 %v4461_v6  ;;  %v3438_v26 = vld [vmem:[%s6137_s30 + $0x100] sm:$0xff]  ;;  %v3440_v30 = vld [vmem:[%s6137_s30 + $0x110] sm:$0xff]  ;;  %v90_v31 = vld [vmem:[%s6137_s30 + $0x28] sm:$0xff] }
  0x15   :  { %180 = vmatprep.subr.mxu0 %v4309_v2  ;;  %406 = vmatprep.subr.mxu1 %v4309_v2  ;;  %v3443_v32 = vld [vmem:[%s6137_s30 + $0x128] sm:$0xff]  ;;  %v89_v33 = vld [vmem:[%s6137_s30 + $0x20] sm:$0xff] }
  0x16   :  { %181 = vmatpush1.msra.mxu0 %v4470_v7  ;;  %407 = vmatpush1.msra.mxu1 %v4470_v7  ;;  %v3442_v34 = vld [vmem:[%s6137_s30 + $0x120] sm:$0xff] }
  0x17   :  { %182 = vmatprep.subr.mxu0 %v4309_v2  ;;  %408 = vmatprep.subr.mxu1 %v4309_v2 }
  0x18   :  { %183 = vmatpush1.msra.mxu0 %v4479_v8  ;;  %409 = vmatpush1.msra.mxu1 %v4479_v8 }
  0x19   :  { %184 = vmatprep.subr.mxu0 %v4309_v2  ;;  %410 = vmatprep.subr.mxu1 %v4309_v2 }
  0x1a   :  { %185 = vmatpush1.msra.mxu0 %v4488_v9  ;;  %411 = vmatpush1.msra.mxu1 %v4488_v9 }
  0x1b   :  { %186 = vmatprep.subr.mxu0 %v4309_v2  ;;  %412 = vmatprep.subr.mxu1 %v4309_v2 }
  0x1c   :  { %187 = vmatpush1.msra.mxu0 %v4497_v10  ;;  %413 = vmatpush1.msra.mxu1 %v4497_v10 }
  0x1d   :  { %188 = vmatprep.subr.mxu0 %v4309_v2  ;;  %414 = vmatprep.subr.mxu1 %v4309_v2 }
  0x1e   :  { %189 = vmatpush1.msra.mxu0 %v4506_v11  ;;  %415 = vmatpush1.msra.mxu1 %v4506_v11 }
  0x1f   :  { %190 = vmatprep.subr.mxu0 %v4309_v2  ;;  %416 = vmatprep.subr.mxu1 %v4309_v2 }
  0x20   :  { %191 = vmatpush1.msra.mxu0 %v4515_v12  ;;  %417 = vmatpush1.msra.mxu1 %v4515_v12 }
  0x21   :  { %192 = vmatprep.subr.mxu0 %v4309_v2  ;;  %418 = vmatprep.subr.mxu1 %v4309_v2 }
  0x22   :  { %193 = vmatpush1.msra.mxu0 %v4524_v13  ;;  %419 = vmatpush1.msra.mxu1 %v4524_v13 }
  0x23   :  { %194 = vmatprep.subr.mxu0 %v4309_v2  ;;  %420 = vmatprep.subr.mxu1 %v4309_v2 }
  0x24   :  { %195 = vmatpush1.msra.mxu0 %v4533_v14  ;;  %421 = vmatpush1.msra.mxu1 %v4533_v14 }
  0x25   :  { %196 = vmatprep.subr.mxu0 %v4309_v2  ;;  %422 = vmatprep.subr.mxu1 %v4309_v2 }
  0x26   :  { %197 = vmatpush1.msra.mxu0 %v4542_v15  ;;  %423 = vmatpush1.msra.mxu1 %v4542_v15 }
  0x27   :  { %198 = vmatprep.subr.mxu0 %v4309_v2  ;;  %424 = vmatprep.subr.mxu1 %v4309_v2 }
  0x28   :  { %199 = vmatpush1.msra.mxu0 %v4551_v16  ;;  %425 = vmatpush1.msra.mxu1 %v4551_v16 }
  0x29   :  { %200 = vmatprep.subr.mxu0 %v4309_v2  ;;  %426 = vmatprep.subr.mxu1 %v4309_v2 }
  0x2a   :  { %201 = vmatpush1.msra.mxu0 %v4560_v17  ;;  %427 = vmatpush1.msra.mxu1 %v4560_v17 }
  0x2b   :  { %224 = vmatprep.subr.mxu0 %v4309_v2  ;;  %450 = vmatprep.subr.mxu1 %v4309_v2 }
  0x2c   :  { %3421 = vmatpush2.msk.msra.mxu0 %vm166_vm0, %v4569_v18  ;;  %3470 = vmatpush2.msk.msra.mxu1 %vm166_vm0, %v4569_v18 }
  0x2d   :  { %226 = vmatprep.subr.mxu0 %v4309_v2  ;;  %452 = vmatprep.subr.mxu1 %v4309_v2 }
  0x2e   :  { %227 = vmatpush2.msra.mxu0 %v4578_v19  ;;  %453 = vmatpush2.msra.mxu1 %v4578_v19 }
  0x2f   :  { %228 = vmatprep.subr.mxu0 %v4309_v2  ;;  %454 = vmatprep.subr.mxu1 %v4309_v2 }
  0x30   :  { %229 = vmatpush2.msra.mxu0 %v4589_v20  ;;  %455 = vmatpush2.msra.mxu1 %v4589_v20 }
  0x31   :  { %230 = vmatprep.subr.mxu0 %v4309_v2  ;;  %456 = vmatprep.subr.mxu1 %v4309_v2 }
  0x32   :  { %231 = vmatpush2.msra.mxu0 %v4598_v21  ;;  %457 = vmatpush2.msra.mxu1 %v4598_v21 }
  0x33   :  { %232 = vmatprep.subr.mxu0 %v4309_v2  ;;  %458 = vmatprep.subr.mxu1 %v4309_v2 }
  0x34   :  { %233 = vmatpush2.msra.mxu0 %v4607_v22  ;;  %3422 = vmatprep.mubr.msk.f32.mxu0 %vm117_vm1, %v86_v23 }
  0x35   :  { %459 = vmatpush2.msra.mxu1 %v4607_v22  ;;  %3471 = vmatprep.mubr.msk.f32.mxu1 %vm117_vm1, %v3439_v24 }
  0x36   :  { %235 = vmatmul.mubr.f32.vlgmr.msra.gmra.mxu0 %v85_v25  ;;  %461 = vmatmul.mubr.f32.vlgmr.msra.gmra.mxu1 %v3438_v26 }
  0x37   :  { %3423 = vmatprep.mubr.msk.f32.mxu0 %vm117_vm1, %v88_v27  ;;  %3472 = vmatprep.mubr.msk.f32.mxu1 %vm117_vm1, %v3441_v28 }
  0x38   :  { %622 = vmatprep.subr.mxu0 %v4309_v2  ;;  %848 = vmatprep.subr.mxu1 %v4309_v2 }
  0x39   :  { %623 = vmatpush1.msra.mxu0 %v4427_v1  ;;  %849 = vmatpush1.msra.mxu1 %v4427_v1 }
  0x3a   :  { %240 = vmatmul.mubr.f32.gmra.mxu0 %v87_v29  ;;  %466 = vmatmul.mubr.f32.gmra.mxu1 %v3440_v30 }
  0x3b   :  { %3424 = vmatprep.mubr.msk.f32.mxu0 %vm117_vm1, %v90_v31  ;;  %3473 = vmatprep.mubr.msk.f32.mxu1 %vm117_vm1, %v3443_v32 }
  0x3c   :  { %27 = vsyncpa [#allocation4], 0  ;;  %v92_v35 = vld [vmem:[%s6137_s30 + $0x38] sm:$0xff]  ;;  %624 = vmatprep.subr.mxu0 %v4309_v2  ;;  %850 = vmatprep.subr.mxu1 %v4309_v2  ;;  %v91_v37 = vld [vmem:[%s6137_s30 + $0x30] sm:$0xff]  ;;  %s4310_s0 = smov 7   ;;  %vm1296_vm2 = vcmask 1043456  }
  0x3d   :  { %v3445_v36 = vld [vmem:[%s6137_s30 + $0x138] sm:$0xff]  ;;  %625 = vmatpush1.msra.mxu0 %v4434_v3  ;;  %851 = vmatpush1.msra.mxu1 %v4434_v3  ;;  %v3444_v38 = vld [vmem:[%s6137_s30 + $0x130] sm:$0xff]  ;;  %v94_v39 = vld [vmem:[%s6137_s30 + $0x48] sm:$0xff]  ;;  %s4311_s24 = smov 14   ;;  %s4312_s25 = smov 21   ;;  %vm1185_vm3 = vcmask 56320  }
  0x3e   :  { %245 = vmatmul.mubr.f32.gmra.mxu0 %v89_v33  ;;  %471 = vmatmul.mubr.f32.gmra.mxu1 %v3442_v34  ;;  %v3447_v40 = vld [vmem:[%s6137_s30 + $0x148] sm:$0xff]  ;;  %v93_v41 = vld [vmem:[%s6137_s30 + $0x40] sm:$0xff]  ;;  %v96_v43 = vld [vmem:[%s6137_s30 + $0x58] sm:$0xff]  ;;  %vm1202_vm4 = vcmask 113664   ;;  %vm1219_vm5 = vcmask 171008   ;;  %vm1247_vm6 = vcmask 228352  }
  0x3f   :  { %3425 = vmatprep.mubr.msk.f32.mxu0 %vm117_vm1, %v92_v35  ;;  %3474 = vmatprep.mubr.msk.f32.mxu1 %vm117_vm1, %v3445_v36  ;;  %v3446_v42 = vld [vmem:[%s6137_s30 + $0x140] sm:$0xff]  ;;  %v3449_v44 = vld [vmem:[%s6137_s30 + $0x158] sm:$0xff]  ;;  %v95_v45 = vld [vmem:[%s6137_s30 + $0x50] sm:$0xff]  ;;  %s6138_s26 = sld [smem:[#allocation8_spill]]  ;;  %vm4313_vm7 = vmmov 0   ;;  %vm1835_vm8 = vcmask 261120  }
  0x40   :  { %626 = vmatprep.subr.mxu0 %v4309_v2  ;;  %852 = vmatprep.subr.mxu1 %v4309_v2  ;;  %v3448_v46 = vld [vmem:[%s6137_s30 + $0x150] sm:$0xff]  ;;  %v98_v47 = vld [vmem:[%s6137_s30 + $0x68] sm:$0xff]  ;;  %v97_v49 = vld [vmem:[%s6137_s30 + $0x60] sm:$0xff]  ;;  %s6139_s3 = sld [smem:[#allocation9_spill]]  ;;  %s4314_s28 = smov 72   ;;  %vm2240_vm9 = vcmask 195584  }
  0x41   :  { %627 = vmatpush1.msra.mxu0 %v4443_v4  ;;  %853 = vmatpush1.msra.mxu1 %v4443_v4  ;;  %v3451_v48 = vld [vmem:[%s6137_s30 + $0x168] sm:$0xff]  ;;  %v3450_v50 = vld [vmem:[%s6137_s30 + $0x160] sm:$0xff]  ;;  %v100_v51 = vld [vmem:[%s6137_s30 + $0x78] sm:$0xff]  ;;  %s4315_s1 = smov 24   ;;  %s4316_s23 = smov 48   ;;  %vm2244_vm10 = vcmask 392192  }
  0x42   :  { %250 = vmatmul.mubr.f32.gmra.mxu0 %v91_v37  ;;  %476 = vmatmul.mubr.f32.gmra.mxu1 %v3444_v38  ;;  %v3453_v52 = vld [vmem:[%s6137_s30 + $0x178] sm:$0xff]  ;;  %v99_v53 = vld [vmem:[%s6137_s30 + $0x70] sm:$0xff]  ;;  %v102_v55 = vld [vmem:[%s6137_s30 + $0x88] sm:$0xff]  ;;  %vm2248_vm11 = vcmask 588800   ;;  %vm2271_vm12 = vcmask 785408   ;;  %vm2365_vm13 = vcmask 146432  }
  0x43   :  { %3426 = vmatprep.mubr.msk.f32.mxu0 %vm117_vm1, %v94_v39  ;;  %3475 = vmatprep.mubr.msk.f32.mxu1 %vm117_vm1, %v3447_v40  ;;  %v3452_v54 = vld [vmem:[%s6137_s30 + $0x170] sm:$0xff]  ;;  %v3455_v56 = vld [vmem:[%s6137_s30 + $0x188] sm:$0xff]  ;;  %v101_v57 = vld [vmem:[%s6137_s30 + $0x80] sm:$0xff]  ;;  %s4317_s2 = smov 16   ;;  %s4318_s17 = smov 96   ;;  %vm2681_vm14 = vcmask 130048  }
  0x44   :  { %628 = vmatprep.subr.mxu0 %v4309_v2  ;;  %854 = vmatprep.subr.mxu1 %v4309_v2  ;;  %v3454_v58 = vld [vmem:[%s6137_s30 + $0x180] sm:$0xff]  ;;  %v104_v59 = vld [vmem:[%s6137_s30 + $0x98] sm:$0xff]  ;;  %v103_v61 = vld [vmem:[%s6137_s30 + $0x90] sm:$0xff]  ;;  %vm2714_vm15 = vcmask 523264  }
  0x45   :  { %629 = vmatpush1.msra.mxu0 %v4452_v5  ;;  %855 = vmatpush1.msra.mxu1 %v4452_v5  ;;  %v3457_v60 = vld [vmem:[%s6137_s30 + $0x198] sm:$0xff]  ;;  %v3456_v62 = vld [vmem:[%s6137_s30 + $0x190] sm:$0xff]  ;;  %v106_v63 = vld [vmem:[%s6137_s30 + $0xa8] sm:$0xff] }
  0x46   :  { %255 = vmatmul.mubr.f32.gmra.mxu0 %v93_v41  ;;  %481 = vmatmul.mubr.f32.gmra.mxu1 %v3446_v42  ;;  %v3459_v0 = vld [vmem:[%s6137_s30 + $0x1a8] sm:$0xff]  ;;  %v105_v1 = vld [vmem:[%s6137_s30 + $0xa0] sm:$0xff]  ;;  %v108_v4 = vld [vmem:[%s6137_s30 + $0xb8] sm:$0xff] }
  0x47   :  { %3427 = vmatprep.mubr.msk.f32.mxu0 %vm117_vm1, %v96_v43  ;;  %3476 = vmatprep.mubr.msk.f32.mxu1 %vm117_vm1, %v3449_v44  ;;  %v3458_v3 = vld [vmem:[%s6137_s30 + $0x1a0] sm:$0xff]  ;;  %v3461_v5 = vld [vmem:[%s6137_s30 + $0x1b8] sm:$0xff]  ;;  %v111_v23 = vld [vmem:[%s6137_s30 + $0xd0] sm:$0xff] }
  0x48   :  { %630 = vmatprep.subr.mxu0 %v4309_v2  ;;  %856 = vmatprep.subr.mxu1 %v4309_v2  ;;  %v3467_v24 = vld [vmem:[%s6137_s30 + $0x1e8] sm:$0xff]  ;;  %v113_v25 = vld [vmem:[%s6137_s30 + $0xe0] sm:$0xff]  ;;  %v3469_v26 = vld [vmem:[%s6137_s30 + $0x1f8] sm:$0xff] }
  0x49   :  { %631 = vmatpush1.msra.mxu0 %v4461_v6  ;;  %857 = vmatpush1.msra.mxu1 %v4461_v6  ;;  %v107_v6 = vld [vmem:[%s6137_s30 + $0xb0] sm:$0xff]  ;;  %v3487_v28 = vld [vmem:[%s6137_s30 + $0x200] sm:$0xff]  ;;  %v3490_v29 = vld [vmem:[%s6137_s30 + $0x218] sm:$0xff] }
  0x4a   :  { %260 = vmatmul.mubr.f32.gmra.mxu0 %v95_v45  ;;  %486 = vmatmul.mubr.f32.gmra.mxu1 %v3448_v46  ;;  %v115_v27 = vld [vmem:[%s6137_s30 + $0xf0] sm:$0xff]  ;;  %v3536_v30 = vld [vmem:[%s6137_s30 + $0x300] sm:$0xff]  ;;  %v3492_v32 = vld [vmem:[%s6137_s30 + $0x228] sm:$0xff] }
  0x4b   :  { %3428 = vmatprep.mubr.msk.f32.mxu0 %vm117_vm1, %v98_v47  ;;  %3477 = vmatprep.mubr.msk.f32.mxu1 %vm117_vm1, %v3451_v48  ;;  %v3489_v31 = vld [vmem:[%s6137_s30 + $0x210] sm:$0xff]  ;;  %v3541_v33 = vld [vmem:[%s6137_s30 + $0x328] sm:$0xff]  ;;  %v3491_v34 = vld [vmem:[%s6137_s30 + $0x220] sm:$0xff] }
  0x4c   :  { %632 = vmatprep.subr.mxu0 %v4309_v2  ;;  %858 = vmatprep.subr.mxu1 %v4309_v2  ;;  %v3494_v35 = vld [vmem:[%s6137_s30 + $0x238] sm:$0xff]  ;;  %v3540_v36 = vld [vmem:[%s6137_s30 + $0x320] sm:$0xff]  ;;  %v3493_v38 = vld [vmem:[%s6137_s30 + $0x230] sm:$0xff] }
  0x4d   :  { %633 = vmatpush1.msra.mxu0 %v4470_v7  ;;  %859 = vmatpush1.msra.mxu1 %v4470_v7  ;;  %v3460_v7 = vld [vmem:[%s6137_s30 + $0x1b0] sm:$0xff]  ;;  %v3543_v37 = vld [vmem:[%s6137_s30 + $0x338] sm:$0xff]  ;;  %v3496_v39 = vld [vmem:[%s6137_s30 + $0x248] sm:$0xff] }
  0x4e   :  { %265 = vmatmul.mubr.f32.gmra.mxu0 %v97_v49  ;;  %491 = vmatmul.mubr.f32.gmra.mxu1 %v3450_v50  ;;  %v3542_v40 = vld [vmem:[%s6137_s30 + $0x330] sm:$0xff]  ;;  %v3545_v41 = vld [vmem:[%s6137_s30 + $0x348] sm:$0xff]  ;;  %v3495_v42 = vld [vmem:[%s6137_s30 + $0x240] sm:$0xff] }
  0x4f   :  { %3429 = vmatprep.mubr.msk.f32.mxu0 %vm117_vm1, %v100_v51  ;;  %3478 = vmatprep.mubr.msk.f32.mxu1 %vm117_vm1, %v3453_v52  ;;  %v3498_v43 = vld [vmem:[%s6137_s30 + $0x258] sm:$0xff]  ;;  %v3544_v44 = vld [vmem:[%s6137_s30 + $0x340] sm:$0xff]  ;;  %v3497_v46 = vld [vmem:[%s6137_s30 + $0x250] sm:$0xff] }
  0x50   :  { %634 = vmatprep.subr.mxu0 %v4309_v2  ;;  %860 = vmatprep.subr.mxu1 %v4309_v2  ;;  %v3547_v45 = vld [vmem:[%s6137_s30 + $0x358] sm:$0xff]  ;;  %v3500_v47 = vld [vmem:[%s6137_s30 + $0x268] sm:$0xff]  ;;  %v3546_v48 = vld [vmem:[%s6137_s30 + $0x350] sm:$0xff] }
  0x51   :  { %635 = vmatpush1.msra.mxu0 %v4479_v8  ;;  %861 = vmatpush1.msra.mxu1 %v4479_v8  ;;  %v110_v8 = vld [vmem:[%s6137_s30 + $0xc8] sm:$0xff]  ;;  %v3499_v50 = vld [vmem:[%s6137_s30 + $0x260] sm:$0xff]  ;;  %v3502_v51 = vld [vmem:[%s6137_s30 + $0x278] sm:$0xff] }
  0x52   :  { %270 = vmatmul.mubr.f32.gmra.mxu0 %v99_v53  ;;  %496 = vmatmul.mubr.f32.gmra.mxu1 %v3452_v54  ;;  %v3549_v49 = vld [vmem:[%s6137_s30 + $0x368] sm:$0xff]  ;;  %v3548_v52 = vld [vmem:[%s6137_s30 + $0x360] sm:$0xff]  ;;  %v3551_v53 = vld [vmem:[%s6137_s30 + $0x378] sm:$0xff] }
  0x53   :  { %3430 = vmatprep.mubr.msk.f32.mxu0 %vm117_vm1, %v102_v55  ;;  %3479 = vmatprep.mubr.msk.f32.mxu1 %vm117_vm1, %v3455_v56  ;;  %v3501_v54 = vld [vmem:[%s6137_s30 + $0x270] sm:$0xff]  ;;  %v3504_v55 = vld [vmem:[%s6137_s30 + $0x288] sm:$0xff] }
  0x54   :  { %636 = vmatprep.subr.mxu0 %v4309_v2  ;;  %862 = vmatprep.subr.mxu1 %v4309_v2  ;;  %v3550_v56 = vld [vmem:[%s6137_s30 + $0x370] sm:$0xff] }
  0x55   :  { %637 = vmatpush1.msra.mxu0 %v4488_v9  ;;  %863 = vmatpush1.msra.mxu1 %v4488_v9  ;;  %v3463_v9 = vld [vmem:[%s6137_s30 + $0x1c8] sm:$0xff] }
  0x56   :  { %275 = vmatmul.mubr.f32.gmra.mxu0 %v101_v57  ;;  %501 = vmatmul.mubr.f32.gmra.mxu1 %v3454_v58  ;;  %v3553_v57 = vld [vmem:[%s6137_s30 + $0x388] sm:$0xff]  ;;  %v3503_v58 = vld [vmem:[%s6137_s30 + $0x280] sm:$0xff] }
  0x57   :  { %3431 = vmatprep.mubr.msk.f32.mxu0 %vm117_vm1, %v104_v59  ;;  %3480 = vmatprep.mubr.msk.f32.mxu1 %vm117_vm1, %v3457_v60  ;;  %v3506_v59 = vld [vmem:[%s6137_s30 + $0x298] sm:$0xff]  ;;  %v3552_v60 = vld [vmem:[%s6137_s30 + $0x380] sm:$0xff] }
  0x58   :  { %638 = vmatprep.subr.mxu0 %v4309_v2  ;;  %864 = vmatprep.subr.mxu1 %v4309_v2 }
  0x59   :  { %639 = vmatpush1.msra.mxu0 %v4497_v10  ;;  %865 = vmatpush1.msra.mxu1 %v4497_v10  ;;  %v109_v10 = vld [vmem:[%s6137_s30 + $0xc0] sm:$0xff] }
  0x5a   :  { %280 = vmatmul.mubr.f32.gmra.mxu0 %v103_v61  ;;  %506 = vmatmul.mubr.f32.gmra.mxu1 %v3456_v62  ;;  %v3555_v61 = vld [vmem:[%s6137_s30 + $0x398] sm:$0xff]  ;;  %v3505_v62 = vld [vmem:[%s6137_s30 + $0x290] sm:$0xff] }
  0x5b   :  { %3432 = vmatprep.mubr.msk.f32.mxu0 %vm117_vm1, %v106_v63  ;;  %3481 = vmatprep.mubr.msk.f32.mxu1 %vm117_vm1, %v3459_v0  ;;  %v3508_v63 = vld [vmem:[%s6137_s30 + $0x2a8] sm:$0xff]  ;;  %v3554_v0 = vld [vmem:[%s6137_s30 + $0x390] sm:$0xff] }
  0x5c   :  { %640 = vmatprep.subr.mxu0 %v4309_v2  ;;  %866 = vmatprep.subr.mxu1 %v4309_v2 }
  0x5d   :  { %641 = vmatpush1.msra.mxu0 %v4506_v11  ;;  %867 = vmatpush1.msra.mxu1 %v4506_v11  ;;  %v3462_v11 = vld [vmem:[%s6137_s30 + $0x1c0] sm:$0xff] }
  0x5e   :  { %285 = vmatmul.mubr.f32.gmra.mxu0 %v105_v1  ;;  %511 = vmatmul.mubr.f32.gmra.mxu1 %v3458_v3  ;;  %v3557_v1 = vld [vmem:[%s6137_s30 + $0x3a8] sm:$0xff]  ;;  %v3507_v3 = vld [vmem:[%s6137_s30 + $0x2a0] sm:$0xff] }
  0x5f   :  { %642 = vmatprep.subr.mxu0 %v4309_v2  ;;  %3433 = vmatprep.mubr.msk.f32.mxu0 %vm117_vm1, %v108_v4  ;;  %v3510_v4 = vld [vmem:[%s6137_s30 + $0x2b8] sm:$0xff] }
  0x60   :  { %3482 = vmatprep.mubr.msk.f32.mxu1 %vm117_vm1, %v3461_v5  ;;  %643 = vmatpush1.msra.mxu0 %v4515_v12  ;;  %v3556_v5 = vld [vmem:[%s6137_s30 + $0x3a0] sm:$0xff] }
  0x61   :  { %868 = vmatprep.subr.mxu1 %v4309_v2  ;;  %644 = vmatprep.subr.mxu0 %v4309_v2 }
  0x62   :  { %290 = vmatmul.mubr.f32.gmra.mxu0 %v107_v6  ;;  %516 = vmatmul.mubr.f32.gmra.mxu1 %v3460_v7  ;;  %v3559_v6 = vld [vmem:[%s6137_s30 + $0x3b8] sm:$0xff]  ;;  %v3509_v7 = vld [vmem:[%s6137_s30 + $0x2b0] sm:$0xff] }
  0x63   :  { %869 = vmatpush1.msra.mxu1 %v4515_v12  ;;  %645 = vmatpush1.msra.mxu0 %v4524_v13  ;;  %v112_v12 = vld [vmem:[%s6137_s30 + $0xd8] sm:$0xff] }
  0x64   :  { %870 = vmatprep.subr.mxu1 %v4309_v2  ;;  %646 = vmatprep.subr.mxu0 %v4309_v2 }
  0x65   :  { %871 = vmatpush1.msra.mxu1 %v4524_v13  ;;  %3434 = vmatprep.mubr.msk.f32.mxu0 %vm117_vm1, %v110_v8  ;;  %v3465_v13 = vld [vmem:[%s6137_s30 + $0x1d8] sm:$0xff]  ;;  %v3512_v8 = vld [vmem:[%s6137_s30 + $0x2c8] sm:$0xff] }
  0x66   :  { %3483 = vmatprep.mubr.msk.f32.mxu1 %vm117_vm1, %v3463_v9  ;;  %647 = vmatpush1.msra.mxu0 %v4533_v14  ;;  %v3558_v9 = vld [vmem:[%s6137_s30 + $0x3b0] sm:$0xff] }
  0x67   :  { %872 = vmatprep.subr.mxu1 %v4309_v2  ;;  %295 = vmatmul.mubr.f32.gmra.mxu0 %v109_v10  ;;  %v3561_v10 = vld [vmem:[%s6137_s30 + $0x3c8] sm:$0xff] }
  0x68   :  { %521 = vmatmul.mubr.f32.gmra.mxu1 %v3462_v11  ;;  %648 = vmatprep.subr.mxu0 %v4309_v2  ;;  %v3511_v11 = vld [vmem:[%s6137_s30 + $0x2c0] sm:$0xff] }
  0x69   :  { %873 = vmatpush1.msra.mxu1 %v4533_v14  ;;  %649 = vmatpush1.msra.mxu0 %v4542_v15  ;;  %v3464_v14 = vld [vmem:[%s6137_s30 + $0x1d0] sm:$0xff] }
  0x6a   :  { %874 = vmatprep.subr.mxu1 %v4309_v2  ;;  %650 = vmatprep.subr.mxu0 %v4309_v2 }
  0x6b   :  { %875 = vmatpush1.msra.mxu1 %v4542_v15  ;;  %3435 = vmatprep.mubr.msk.f32.mxu0 %vm117_vm1, %v112_v12  ;;  %v114_v15 = vld [vmem:[%s6137_s30 + $0xe8] sm:$0xff]  ;;  %v3514_v12 = vld [vmem:[%s6137_s30 + $0x2d8] sm:$0xff] }
  0x6c   :  { %3484 = vmatprep.mubr.msk.f32.mxu1 %vm117_vm1, %v3465_v13  ;;  %651 = vmatpush1.msra.mxu0 %v4551_v16  ;;  %v3560_v13 = vld [vmem:[%s6137_s30 + $0x3c0] sm:$0xff] }
  0x6d   :  { %876 = vmatprep.subr.mxu1 %v4309_v2  ;;  %300 = vmatmul.mubr.f32.gmra.mxu0 %v111_v23  ;;  %v3563_v23 = vld [vmem:[%s6137_s30 + $0x3d8] sm:$0xff] }
  0x6e   :  { %526 = vmatmul.mubr.f32.gmra.mxu1 %v3464_v14  ;;  %652 = vmatprep.subr.mxu0 %v4309_v2  ;;  %v3513_v14 = vld [vmem:[%s6137_s30 + $0x2d0] sm:$0xff] }
  0x6f   :  { %877 = vmatpush1.msra.mxu1 %v4551_v16  ;;  %653 = vmatpush1.msra.mxu0 %v4560_v17  ;;  %v3466_v16 = vld [vmem:[%s6137_s30 + $0x1e0] sm:$0xff] }
  0x70   :  { %878 = vmatprep.subr.mxu1 %v4309_v2  ;;  %676 = vmatprep.subr.mxu0 %v4309_v2 }
  0x71   :  { %879 = vmatpush1.msra.mxu1 %v4560_v17  ;;  %3436 = vmatprep.mubr.msk.f32.mxu0 %vm117_vm1, %v114_v15  ;;  %v116_v17 = vld [vmem:[%s6137_s30 + $0xf8] sm:$0xff]  ;;  %v3516_v15 = vld [vmem:[%s6137_s30 + $0x2e8] sm:$0xff] }
  0x72   :  { %3485 = vmatprep.mubr.msk.f32.mxu1 %vm117_vm1, %v3467_v24  ;;  %3519 = vmatpush2.msk.msra.mxu0 %vm166_vm0, %v4569_v18  ;;  %v3562_v24 = vld [vmem:[%s6137_s30 + $0x3d0] sm:$0xff] }
  0x73   :  { %902 = vmatprep.subr.mxu1 %v4309_v2  ;;  %305 = vmatmul.mubr.f32.gmra.mxu0 %v113_v25  ;;  %v3565_v25 = vld [vmem:[%s6137_s30 + $0x3e8] sm:$0xff] }
  0x74   :  { %531 = vmatmul.mubr.f32.gmra.mxu1 %v3466_v16  ;;  %678 = vmatprep.subr.mxu0 %v4309_v2  ;;  %v3515_v16 = vld [vmem:[%s6137_s30 + $0x2e0] sm:$0xff] }
  0x75   :  { %3568 = vmatpush2.msk.msra.mxu1 %vm166_vm0, %v4569_v18  ;;  %679 = vmatpush2.msra.mxu0 %v4578_v19  ;;  %v3468_v18 = vld [vmem:[%s6137_s30 + $0x1f0] sm:$0xff] }
  0x76   :  { %904 = vmatprep.subr.mxu1 %v4309_v2  ;;  %680 = vmatprep.subr.mxu0 %v4309_v2 }
  0x77   :  { %905 = vmatpush2.msra.mxu1 %v4578_v19  ;;  %3437 = vmatprep.mubr.msk.f32.mxu0 %vm117_vm1, %v116_v17  ;;  %v3488_v19 = vld [vmem:[%s6137_s30 + $0x208] sm:$0xff]  ;;  %v3518_v17 = vld [vmem:[%s6137_s30 + $0x2f8] sm:$0xff] }
  0x78   :  { %3486 = vmatprep.mubr.msk.f32.mxu1 %vm117_vm1, %v3469_v26  ;;  %681 = vmatpush2.msra.mxu0 %v4589_v20  ;;  %v3564_v26 = vld [vmem:[%s6137_s30 + $0x3e0] sm:$0xff] }
  0x79   :  { %906 = vmatprep.subr.mxu1 %v4309_v2  ;;  %310 = vmatmul.mubr.f32.gmra.mxu0 %v115_v27  ;;  %v3567_v27 = vld [vmem:[%s6137_s30 + $0x3f8] sm:$0xff] }
  0x7a   :  { %536 = vmatmul.mubr.f32.gmra.mxu1 %v3468_v18  ;;  %682 = vmatprep.subr.mxu0 %v4309_v2  ;;  %v3517_v18 = vld [vmem:[%s6137_s30 + $0x2f0] sm:$0xff] }
  0x7b   :  { %907 = vmatpush2.msra.mxu1 %v4589_v20  ;;  %683 = vmatpush2.msra.mxu0 %v4598_v21  ;;  %v3537_v20 = vld [vmem:[%s6137_s30 + $0x308] sm:$0xff] }
  0x7c   :  { %908 = vmatprep.subr.mxu1 %v4309_v2  ;;  %684 = vmatprep.subr.mxu0 %v4309_v2 }
  0x7d   :  { %909 = vmatpush2.msra.mxu1 %v4598_v21  ;;  %685 = vmatpush2.msra.mxu0 %v4607_v22  ;;  %v3539_v21 = vld [vmem:[%s6137_s30 + $0x318] sm:$0xff] }
  0x7e   :  { %3520 = vmatprep.mubr.msk.f32.mxu0 %vm117_vm1, %v3488_v19  ;;  %910 = vmatprep.subr.mxu1 %v4309_v2  ;;  %v3566_v19 = vld [vmem:[%s6137_s30 + $0x3f0] sm:$0xff] }
  0x7f   :  { %687 = vmatmul.mubr.f32.vlgmr.msra.gmra.mxu0 %v3487_v28  ;;  %911 = vmatpush2.msra.mxu1 %v4607_v22  ;;  %v3538_v22 = vld [vmem:[%s6137_s30 + $0x310] sm:$0xff] }
  0x80   :  { %3569 = vmatprep.mubr.msk.f32.mxu1 %vm117_vm1, %v3537_v20  ;;  %3521 = vmatprep.mubr.msk.f32.mxu0 %vm117_vm1, %v3490_v29 }
  0x81   :  { %913 = vmatmul.mubr.f32.vlgmr.msra.gmra.mxu1 %v3536_v30 }
  0x82   :  { %3570 = vmatprep.mubr.msk.f32.mxu1 %vm117_vm1, %v3539_v21 }
  0x83   :  { %692 = vmatmul.mubr.f32.gmra.mxu0 %v3489_v31 }
  0x84   :  { %3522 = vmatprep.mubr.msk.f32.mxu0 %vm117_vm1, %v3492_v32 }
  0x85   :  { %918 = vmatmul.mubr.f32.gmra.mxu1 %v3538_v22 }
  0x86   :  { %3571 = vmatprep.mubr.msk.f32.mxu1 %vm117_vm1, %v3541_v33 }
  0x87   :  { %697 = vmatmul.mubr.f32.gmra.mxu0 %v3491_v34 }
  0x88   :  { %3523 = vmatprep.mubr.msk.f32.mxu0 %vm117_vm1, %v3494_v35 }
  0x89   :  { %923 = vmatmul.mubr.f32.gmra.mxu1 %v3540_v36 }
  0x8a   :  { %3572 = vmatprep.mubr.msk.f32.mxu1 %vm117_vm1, %v3543_v37 }
  0x8b   :  { %702 = vmatmul.mubr.f32.gmra.mxu0 %v3493_v38 }
  0x8c   :  { %3524 = vmatprep.mubr.msk.f32.mxu0 %vm117_vm1, %v3496_v39 }
  0x8d   :  { %928 = vmatmul.mubr.f32.gmra.mxu1 %v3542_v40 }
  0x8e   :  { %3573 = vmatprep.mubr.msk.f32.mxu1 %vm117_vm1, %v3545_v41 }
  0x8f   :  { %707 = vmatmul.mubr.f32.gmra.mxu0 %v3495_v42 }
  0x90   :  { %3525 = vmatprep.mubr.msk.f32.mxu0 %vm117_vm1, %v3498_v43 }
  0x91   :  { %933 = vmatmul.mubr.f32.gmra.mxu1 %v3544_v44 }
  0x92   :  { %3574 = vmatprep.mubr.msk.f32.mxu1 %vm117_vm1, %v3547_v45 }
  0x93   :  { %712 = vmatmul.mubr.f32.gmra.mxu0 %v3497_v46 }
  0x94   :  { %3526 = vmatprep.mubr.msk.f32.mxu0 %vm117_vm1, %v3500_v47 }
  0x95   :  { %938 = vmatmul.mubr.f32.gmra.mxu1 %v3546_v48 }
  0x96   :  { %3575 = vmatprep.mubr.msk.f32.mxu1 %vm117_vm1, %v3549_v49 }
  0x97   :  { %717 = vmatmul.mubr.f32.gmra.mxu0 %v3499_v50 }
  0x98   :  { %3527 = vmatprep.mubr.msk.f32.mxu0 %vm117_vm1, %v3502_v51 }
  0x99   :  { %943 = vmatmul.mubr.f32.gmra.mxu1 %v3548_v52 }
  0x9a   :  { %3576 = vmatprep.mubr.msk.f32.mxu1 %vm117_vm1, %v3551_v53 }
  0x9b   :  { %722 = vmatmul.mubr.f32.gmra.mxu0 %v3501_v54 }
  0x9c   :  { %3528 = vmatprep.mubr.msk.f32.mxu0 %vm117_vm1, %v3504_v55 }
  0x9d   :  { %948 = vmatmul.mubr.f32.gmra.mxu1 %v3550_v56 }
  0x9e   :  { %3577 = vmatprep.mubr.msk.f32.mxu1 %vm117_vm1, %v3553_v57 }
  0x9f   :  { %727 = vmatmul.mubr.f32.gmra.mxu0 %v3503_v58 }
  0xa0   :  { %3529 = vmatprep.mubr.msk.f32.mxu0 %vm117_vm1, %v3506_v59 }
  0xa1   :  { %953 = vmatmul.mubr.f32.gmra.mxu1 %v3552_v60 }
  0xa2   :  { %3578 = vmatprep.mubr.msk.f32.mxu1 %vm117_vm1, %v3555_v61 }
  0xa3   :  { %732 = vmatmul.mubr.f32.gmra.mxu0 %v3505_v62 }
  0xa4   :  { %3530 = vmatprep.mubr.msk.f32.mxu0 %vm117_vm1, %v3508_v63 }
  0xa5   :  { %958 = vmatmul.mubr.f32.gmra.mxu1 %v3554_v0 }
  0xa6   :  { %3579 = vmatprep.mubr.msk.f32.mxu1 %vm117_vm1, %v3557_v1 }
  0xa7   :  { %737 = vmatmul.mubr.f32.gmra.mxu0 %v3507_v3 }
  0xa8   :  { %3531 = vmatprep.mubr.msk.f32.mxu0 %vm117_vm1, %v3510_v4 }
  0xa9   :  { %963 = vmatmul.mubr.f32.gmra.mxu1 %v3556_v5 }
  0xaa   :  { %3580 = vmatprep.mubr.msk.f32.mxu1 %vm117_vm1, %v3559_v6 }
  0xab   :  { %742 = vmatmul.mubr.f32.gmra.mxu0 %v3509_v7 }
  0xac   :  { %3532 = vmatprep.mubr.msk.f32.mxu0 %vm117_vm1, %v3512_v8 }
  0xad   :  { %968 = vmatmul.mubr.f32.gmra.mxu1 %v3558_v9 }
  0xae   :  { %3581 = vmatprep.mubr.msk.f32.mxu1 %vm117_vm1, %v3561_v10 }
  0xaf   :  { %747 = vmatmul.mubr.f32.gmra.mxu0 %v3511_v11 }
  0xb0   :  { %3533 = vmatprep.mubr.msk.f32.mxu0 %vm117_vm1, %v3514_v12 }
  0xb1   :  { %973 = vmatmul.mubr.f32.gmra.mxu1 %v3560_v13 }
  0xb2   :  { %3582 = vmatprep.mubr.msk.f32.mxu1 %vm117_vm1, %v3563_v23 }
  0xb3   :  { %752 = vmatmul.mubr.f32.gmra.mxu0 %v3513_v14 }
  0xb4   :  { %3534 = vmatprep.mubr.msk.f32.mxu0 %vm117_vm1, %v3516_v15 }
  0xb5   :  { %978 = vmatmul.mubr.f32.gmra.mxu1 %v3562_v24 }
  0xb6   :  { %3583 = vmatprep.mubr.msk.f32.mxu1 %vm117_vm1, %v3565_v25 }
  0xb7   :  { %757 = vmatmul.mubr.f32.gmra.mxu0 %v3515_v16 }
  0xb8   :  { %3535 = vmatprep.mubr.msk.f32.mxu0 %vm117_vm1, %v3518_v17  ;;  %v1239_v17 = vld [vmem:[%s6114_s6 + $0x18] sm:$0xf] }
  0xb9   :  { %983 = vmatmul.mubr.f32.gmra.mxu1 %v3564_v26  ;;  %3885 = vmatprep.subr.msk.mxu0 %vm1296_vm2, %v1239_v17 }
  0xba   :  { %3584 = vmatprep.mubr.msk.f32.mxu1 %vm117_vm1, %v3567_v27  ;;  %3886 = vmatpush3.msk.msra.mxu0 %vm1296_vm2, %v1239_v17  ;;  %vm3297_vm1 = vcmask 41984   ;;  %vm3401_vm2 = vcmask 1024  }
  0xbb   :  { %762 = vmatmul.mubr.f32.gmra.mxu0 %v3517_v18  ;;  %v1238_v18 = vld [vmem:[%s6114_s6 + $0x10] sm:$0xff] }
  0xbc   :  { %3887 = vmatprep.subr.mxu0 %v1238_v18 }
  0xbd   :  { %988 = vmatmul.mubr.f32.gmra.mxu1 %v3566_v19  ;;  %v1237_v19 = vld [vmem:[%s6114_s6 + $0x8] sm:$0xff]  ;;  %3888 = vmatpush3.msra.mxu0 %v1238_v18 }
  0xbe   :  { %3889 = vmatprep.subr.mxu0 %v1237_v19 }
  0xbf   :  { %3890 = vmatpush3.msra.mxu0 %v1237_v19 }
  0xf6   :  { %v5149_v28 = vpop.f32.mrf.mxu0  ;;  %v462_v20 = vpop.f32.mrf.mxu1 }
  0xf7   :  { %1009 = vrot.lane.b32.xlu0 %v462_v20, %s4310_s0  ;;  %v1236_v20 = vld [vmem:[%s6114_s6] sm:$0xff] }
  0xf8   :  { %v238_v29 = vpop.f32.mrf.mxu0  ;;  %v464_v30 = vpop.f32.mrf.mxu1  ;;  %3891 = vmatprep.subr.mxu0 %v1236_v20 }
  0xf9   :  { %3892 = vmatpush3.msra.mxu0 %v1236_v20 }
  0xfa   :  { %v5152_v21 = vpop.f32.mrf.mxu0  ;;  %v467_v31 = vpop.f32.mrf.mxu1 }
  0xfb   :  { %1011 = vrot.lane.b32.xlu0 %v467_v31, %s4310_s0 }
  0xfc   :  { %v243_v32 = vpop.f32.mrf.mxu0  ;;  %v469_v22 = vpop.f32.mrf.mxu1 }
  0xfe   :  { %v5155_v33 = vpop.f32.mrf.mxu0  ;;  %v472_v34 = vpop.f32.mrf.mxu1 }
  0xff   :  { %1013 = vrot.lane.b32.xlu0 %v472_v34, %s4310_s0 }
 0x100   :  { %v248_v35 = vpop.f32.mrf.mxu0  ;;  %v474_v36 = vpop.f32.mrf.mxu1 }
 0x102   :  { %v5158_v37 = vpop.f32.mrf.mxu0  ;;  %v477_v38 = vpop.f32.mrf.mxu1 }
 0x103   :  { %1015 = vrot.lane.b32.xlu1 %v477_v38, %s4310_s0 }
 0x104   :  { %v253_v39 = vpop.f32.mrf.mxu0  ;;  %v479_v40 = vpop.f32.mrf.mxu1 }
 0x106   :  { %v5161_v41 = vpop.f32.mrf.mxu0  ;;  %v482_v42 = vpop.f32.mrf.mxu1 }
 0x107   :  { %1017 = vrot.lane.b32.xlu0 %v482_v42, %s4310_s0 }
 0x108   :  { %v258_v43 = vpop.f32.mrf.mxu0  ;;  %v484_v44 = vpop.f32.mrf.mxu1 }
 0x10a   :  { %v5164_v45 = vpop.f32.mrf.mxu0  ;;  %v487_v46 = vpop.f32.mrf.mxu1 }
 0x10b   :  { %1019 = vrot.lane.b32.xlu1 %v487_v46, %s4310_s0 }
 0x10c   :  { %v263_v47 = vpop.f32.mrf.mxu0  ;;  %v489_v48 = vpop.f32.mrf.mxu1 }
 0x10e   :  { %v5167_v49 = vpop.f32.mrf.mxu0  ;;  %v492_v50 = vpop.f32.mrf.mxu1 }
 0x10f   :  { %1021 = vrot.lane.b32.xlu0 %v492_v50, %s4310_s0 }
 0x110   :  { %v268_v51 = vpop.f32.mrf.mxu0  ;;  %v494_v52 = vpop.f32.mrf.mxu1 }
 0x112   :  { %v5170_v53 = vpop.f32.mrf.mxu0  ;;  %v497_v54 = vpop.f32.mrf.mxu1 }
 0x113   :  { %1023 = vrot.lane.b32.xlu1 %v497_v54, %s4310_s0 }
 0x114   :  { %v273_v55 = vpop.f32.mrf.mxu0  ;;  %v499_v56 = vpop.f32.mrf.mxu1 }
 0x116   :  { %v5173_v57 = vpop.f32.mrf.mxu0  ;;  %v502_v58 = vpop.f32.mrf.mxu1 }
 0x117   :  { %1025 = vrot.lane.b32.xlu0 %v502_v58, %s4310_s0 }
 0x118   :  { %v278_v59 = vpop.f32.mrf.mxu0  ;;  %v504_v60 = vpop.f32.mrf.mxu1 }
 0x11a   :  { %v5176_v61 = vpop.f32.mrf.mxu0  ;;  %v507_v62 = vpop.f32.mrf.mxu1 }
 0x11b   :  { %1027 = vrot.lane.b32.xlu1 %v507_v62, %s4310_s0 }
 0x11c   :  { %v283_v63 = vpop.f32.mrf.mxu0  ;;  %v509_v0 = vpop.f32.mrf.mxu1 }
 0x11e   :  { %v5179_v1 = vpop.f32.mrf.mxu0  ;;  %v512_v3 = vpop.f32.mrf.mxu1 }
 0x11f   :  { %1029 = vrot.lane.b32.xlu0 %v512_v3, %s4310_s0 }
 0x120   :  { %v288_v4 = vpop.f32.mrf.mxu0  ;;  %v514_v5 = vpop.f32.mrf.mxu1 }
 0x122   :  { %v5182_v6 = vpop.f32.mrf.mxu0  ;;  %v517_v7 = vpop.f32.mrf.mxu1 }
 0x123   :  { %1031 = vrot.lane.b32.xlu1 %v517_v7, %s4310_s0 }
 0x124   :  { %v293_v8 = vpop.f32.mrf.mxu0  ;;  %v519_v9 = vpop.f32.mrf.mxu1 }
 0x127   :  { %v5185_v10 = vpop.f32.mrf.mxu0 }
 0x128   :  { %v522_v11 = vpop.f32.mrf.mxu1 }
 0x129   :  { %1033 = vrot.lane.b32.xlu0 %v522_v11, %s4310_s0  ;;  %v298_v12 = vpop.f32.mrf.mxu0 }
 0x12a   :  { %v524_v13 = vpop.f32.mrf.mxu1 }
 0x12d   :  { %v5188_v23 = vpop.f32.mrf.mxu0 }
 0x12e   :  { %v527_v14 = vpop.f32.mrf.mxu1 }
 0x12f   :  { %1035 = vrot.lane.b32.xlu1 %v527_v14, %s4310_s0  ;;  %v303_v15 = vpop.f32.mrf.mxu0 }
 0x130   :  { %v529_v24 = vpop.f32.mrf.mxu1 }
 0x133   :  { %v5191_v25 = vpop.f32.mrf.mxu0 }
 0x134   :  { %v532_v16 = vpop.f32.mrf.mxu1 }
 0x135   :  { %1037 = vrot.lane.b32.xlu0 %v532_v16, %s4310_s0  ;;  %v308_v26 = vpop.f32.mrf.mxu0 }
 0x136   :  { %v534_v27 = vpop.f32.mrf.mxu1 }
 0x139   :  { %v5206_v29 = vpop.f32.mrf.mxu0 }
 0x13a   :  { %v537_v30 = vpop.f32.mrf.mxu1 }
 0x13b   :  { %1039 = vrot.lane.b32.xlu1 %v537_v30, %s4310_s0  ;;  %v313_v31 = vpop.f32.mrf.mxu0 }
 0x13c   :  { %v539_v32 = vpop.f32.mrf.mxu1 }
 0x13f   :  { %v688_v22 = vpop.f32.mrf.mxu0 }
 0x140   :  { %1073 = vrot.lane.b32.xlu1 %v688_v22, %s4311_s24 }
 0x141   :  { %v914_v34 = vpop.f32.mrf.mxu1  ;;  %v690_v35 = vpop.f32.mrf.mxu0 }
 0x142   :  { %1137 = vrot.lane.b32.xlu0 %v914_v34, %s4312_s25 }
 0x143   :  { %v693_v36 = vpop.f32.mrf.mxu0  ;;  %v916_v38 = vpop.f32.mrf.mxu1 }
 0x144   :  { %1075 = vrot.lane.b32.xlu1 %v693_v36, %s4311_s24 }
 0x145   :  { %v695_v39 = vpop.f32.mrf.mxu0  ;;  %v919_v40 = vpop.f32.mrf.mxu1 }
 0x147   :  { %v698_v42 = vpop.f32.mrf.mxu0  ;;  %v921_v43 = vpop.f32.mrf.mxu1 }
 0x148   :  { %1139 = vrot.lane.b32.xlu1 %v919_v40, %s4312_s25  ;;  %1077 = vrot.lane.b32.xlu0 %v698_v42, %s4311_s24 }
 0x149   :  { %v700_v44 = vpop.f32.mrf.mxu0  ;;  %v924_v46 = vpop.f32.mrf.mxu1 }
 0x14b   :  { %v703_v47 = vpop.f32.mrf.mxu0  ;;  %v926_v48 = vpop.f32.mrf.mxu1 }
 0x14c   :  { %1141 = vrot.lane.b32.xlu0 %v924_v46, %s4312_s25  ;;  %1079 = vrot.lane.b32.xlu1 %v703_v47, %s4311_s24 }
 0x14d   :  { %v705_v50 = vpop.f32.mrf.mxu0  ;;  %v929_v51 = vpop.f32.mrf.mxu1 }
 0x14f   :  { %v708_v52 = vpop.f32.mrf.mxu0  ;;  %v931_v54 = vpop.f32.mrf.mxu1 }
 0x150   :  { %1143 = vrot.lane.b32.xlu1 %v929_v51, %s4312_s25  ;;  %1081 = vrot.lane.b32.xlu0 %v708_v52, %s4311_s24 }
 0x151   :  { %v710_v55 = vpop.f32.mrf.mxu0  ;;  %v934_v56 = vpop.f32.mrf.mxu1 }
 0x153   :  { %v713_v58 = vpop.f32.mrf.mxu0  ;;  %v936_v59 = vpop.f32.mrf.mxu1 }
 0x154   :  { %1145 = vrot.lane.b32.xlu0 %v934_v56, %s4312_s25  ;;  %1083 = vrot.lane.b32.xlu1 %v713_v58, %s4311_s24 }
 0x155   :  { %v715_v60 = vpop.f32.mrf.mxu0  ;;  %v939_v62 = vpop.f32.mrf.mxu1 }
 0x157   :  { %v718_v63 = vpop.f32.mrf.mxu0  ;;  %v941_v0 = vpop.f32.mrf.mxu1 }
 0x158   :  { %1147 = vrot.lane.b32.xlu1 %v939_v62, %s4312_s25  ;;  %1085 = vrot.lane.b32.xlu0 %v718_v63, %s4311_s24 }
 0x159   :  { %v720_v3 = vpop.f32.mrf.mxu0  ;;  %v944_v4 = vpop.f32.mrf.mxu1 }
 0x15b   :  { %v723_v5 = vpop.f32.mrf.mxu0  ;;  %v946_v7 = vpop.f32.mrf.mxu1 }
 0x15c   :  { %1149 = vrot.lane.b32.xlu0 %v944_v4, %s4312_s25  ;;  %1087 = vrot.lane.b32.xlu1 %v723_v5, %s4311_s24 }
 0x15d   :  { %v725_v8 = vpop.f32.mrf.mxu0  ;;  %v949_v9 = vpop.f32.mrf.mxu1 }
 0x15f   :  { %v728_v11 = vpop.f32.mrf.mxu0  ;;  %v951_v12 = vpop.f32.mrf.mxu1 }
 0x160   :  { %1151 = vrot.lane.b32.xlu1 %v949_v9, %s4312_s25  ;;  %1089 = vrot.lane.b32.xlu0 %v728_v11, %s4311_s24 }
 0x161   :  { %v730_v13 = vpop.f32.mrf.mxu0  ;;  %v954_v14 = vpop.f32.mrf.mxu1 }
 0x163   :  { %v733_v15 = vpop.f32.mrf.mxu0  ;;  %v956_v24 = vpop.f32.mrf.mxu1 }
 0x164   :  { %1153 = vrot.lane.b32.xlu0 %v954_v14, %s4312_s25  ;;  %1091 = vrot.lane.b32.xlu1 %v733_v15, %s4311_s24 }
 0x165   :  { %v735_v16 = vpop.f32.mrf.mxu0  ;;  %v959_v17 = vpop.f32.mrf.mxu1 }
 0x167   :  { %v738_v26 = vpop.f32.mrf.mxu0  ;;  %v961_v27 = vpop.f32.mrf.mxu1 }
 0x168   :  { %1155 = vrot.lane.b32.xlu1 %v959_v17, %s4312_s25  ;;  %1093 = vrot.lane.b32.xlu0 %v738_v26, %s4311_s24 }
 0x169   :  { %v740_v18 = vpop.f32.mrf.mxu0  ;;  %v964_v19 = vpop.f32.mrf.mxu1 }
 0x16a   :  { %v1010_v55 = vpop.permute.xlu0 %1009 }
 0x16b   :  { %v743_v20 = vpop.f32.mrf.mxu0  ;;  %v966_v30 = vpop.f32.mrf.mxu1  ;;  %v1186_v13 = vsel %vm1185_vm3, %v5149_v28, %v1010_v55 }
 0x16c   :  { %1157 = vrot.lane.b32.xlu0 %v964_v19, %s4312_s25  ;;  %1095 = vrot.lane.b32.xlu1 %v743_v20, %s4311_s24 }
 0x16d   :  { %v745_v31 = vpop.f32.mrf.mxu0  ;;  %v969_v32 = vpop.f32.mrf.mxu1 }
 0x16e   :  { %v1012_v56 = vpop.permute.xlu0 %1011 }
 0x16f   :  { %v748_v22 = vpop.f32.mrf.mxu0  ;;  %v971_v34 = vpop.f32.mrf.mxu1  ;;  %v1187_v26 = vsel %vm1185_vm3, %v5152_v21, %v1012_v56 }
 0x170   :  { %1159 = vrot.lane.b32.xlu1 %v969_v32, %s4312_s25  ;;  %1097 = vrot.lane.b32.xlu0 %v748_v22, %s4311_s24 }
 0x171   :  { %v750_v35 = vpop.f32.mrf.mxu0  ;;  %v974_v36 = vpop.f32.mrf.mxu1 }
 0x172   :  { %v1014_v59 = vpop.permute.xlu0 %1013 }
 0x173   :  { %v753_v38 = vpop.f32.mrf.mxu0  ;;  %v976_v39 = vpop.f32.mrf.mxu1  ;;  %v1188_v20 = vsel %vm1185_vm3, %v5155_v33, %v1014_v59 }
 0x174   :  { %1161 = vrot.lane.b32.xlu0 %v974_v36, %s4312_s25  ;;  %1099 = vrot.lane.b32.xlu1 %v753_v38, %s4311_s24 }
 0x175   :  { %v755_v40 = vpop.f32.mrf.mxu0  ;;  %v979_v42 = vpop.f32.mrf.mxu1 }
 0x176   :  { %v1016_v58 = vpop.permute.xlu1 %1015 }
 0x177   :  { %v758_v43 = vpop.f32.mrf.mxu0  ;;  %v981_v44 = vpop.f32.mrf.mxu1  ;;  %v1189_v21 = vsel %vm1185_vm3, %v5158_v37, %v1016_v58 }
 0x178   :  { %1163 = vrot.lane.b32.xlu1 %v979_v42, %s4312_s25  ;;  %1101 = vrot.lane.b32.xlu0 %v758_v43, %s4311_s24 }
 0x179   :  { %v760_v46 = vpop.f32.mrf.mxu0  ;;  %v984_v47 = vpop.f32.mrf.mxu1 }
 0x17a   :  { %v1018_v62 = vpop.permute.xlu0 %1017 }
 0x17b   :  { %v763_v48 = vpop.f32.mrf.mxu0  ;;  %v986_v50 = vpop.f32.mrf.mxu1  ;;  %v1190_v33 = vsel %vm1185_vm3, %v5161_v41, %v1018_v62 }
 0x17c   :  { %1165 = vrot.lane.b32.xlu0 %v984_v47, %s4312_s25  ;;  %1103 = vrot.lane.b32.xlu1 %v763_v48, %s4311_s24 }
 0x17d   :  { %v765_v51 = vpop.f32.mrf.mxu0  ;;  %v989_v52 = vpop.f32.mrf.mxu1 }
 0x17e   :  { %v1020_v60 = vpop.permute.xlu1 %1019 }
 0x17f   :  { %v991_v54 = vpop.f32.mrf.mxu1  ;;  %v1191_v37 = vsel %vm1185_vm3, %v5164_v45, %v1020_v60 }
 0x180   :  { %1167 = vrot.lane.b32.xlu1 %v989_v52, %s4312_s25 }
 0x181   :  { %v1022_v0 = vpop.permute.xlu0 %1021 }
 0x182   :  { %v1192_v41 = vsel %vm1185_vm3, %v5167_v49, %v1022_v0 }
 0x185   :  { %v1024_v63 = vpop.permute.xlu1 %1023 }
 0x186   :  { %v1193_v45 = vsel %vm1185_vm3, %v5170_v53, %v1024_v63 }
 0x189   :  { %v1026_v4 = vpop.permute.xlu0 %1025 }
 0x18a   :  { %v1194_v49 = vsel %vm1185_vm3, %v5173_v57, %v1026_v4 }
 0x18d   :  { %v5241_v3 = vpop.permute.xlu1 %1027 }
 0x18e   :  { %v1195_v53 = vsel %vm1185_vm3, %v5176_v61, %v5241_v3 }
 0x191   :  { %v5245_v7 = vpop.permute.xlu0 %1029 }
 0x192   :  { %v1196_v57 = vsel %vm1185_vm3, %v5179_v1, %v5245_v7 }
 0x195   :  { %v5243_v5 = vpop.permute.xlu1 %1031 }
 0x196   :  { %v1197_v61 = vsel %vm1185_vm3, %v5182_v6, %v5243_v5 }
 0x19b   :  { %v5249_v9 = vpop.permute.xlu0 %1033 }
 0x19c   :  { %v1198_v1 = vsel %vm1185_vm3, %v5185_v10, %v5249_v9 }
 0x1a1   :  { %v5247_v8 = vpop.permute.xlu1 %1035 }
 0x1a2   :  { %v1199_v6 = vsel %vm1185_vm3, %v5188_v23, %v5247_v8 }
 0x1a7   :  { %v5253_v12 = vpop.permute.xlu0 %1037 }
 0x1a8   :  { %v1200_v10 = vsel %vm1185_vm3, %v5191_v25, %v5253_v12  ;;  %v1461_v25 = vld [vmem:[%s6138_s26] sm:$0xff] }
 0x1a9   :  { %v3603_v12 = vld [vmem:[%s6138_s26 + $0x20] sm:$0xff]  ;;  %3949 = vmatprep.mubr.f32.mxu1 %v1461_v25  ;;  %v3610_v25 = vld [vmem:[%s6138_s26 + $0x58] sm:$0xff] }
 0x1ad   :  { %v5251_v11 = vpop.permute.xlu1 %1039 }
 0x1ae   :  { %v1201_v23 = vsel %vm1185_vm3, %v5206_v29, %v5251_v11 }
 0x1b2   :  { %v1074_v14 = vpop.permute.xlu1 %1073 }
 0x1b3   :  { %v1203_v15 = vsel %vm1202_vm4, %v1186_v13, %v1074_v14 }
 0x1b4   :  { %v1138_v24 = vpop.permute.xlu0 %1137 }
 0x1b5   :  { %v1220_v16 = vsel %vm1219_vm5, %v1203_v15, %v1138_v24 }
 0x1b6   :  { %3893 = vmatprep.mubr.msk.f32.mxu0 %vm1247_vm6, %v1220_v16  ;;  %v1076_v17 = vpop.permute.xlu1 %1075 }
 0x1b7   :  { %v1204_v27 = vsel %vm1202_vm4, %v1187_v26, %v1076_v17 }
 0x1ba   :  { %v1140_v18 = vpop.permute.xlu1 %1139  ;;  %v1078_v19 = vpop.permute.xlu0 %1077 }
 0x1bb   :  { %v1221_v28 = vsel %vm1219_vm5, %v1204_v27, %v1140_v18  ;;  %v1205_v30 = vsel %vm1202_vm4, %v1188_v20, %v1078_v19 }
 0x1bc   :  { %3894 = vmatmul.mubr.msk.f32.vlgmr.msra.gmra.mxu0 %vm1247_vm6, %v1221_v28 }
 0x1be   :  { %v1142_v31 = vpop.permute.xlu0 %1141  ;;  %v1080_v32 = vpop.permute.xlu1 %1079 }
 0x1bf   :  { %v1222_v22 = vsel %vm1219_vm5, %v1205_v30, %v1142_v31  ;;  %v1206_v34 = vsel %vm1202_vm4, %v1189_v21, %v1080_v32 }
 0x1c0   :  { %3896 = vmatprep.mubr.msk.f32.mxu0 %vm1247_vm6, %v1222_v22 }
 0x1c2   :  { %v1144_v35 = vpop.permute.xlu1 %1143  ;;  %v1082_v36 = vpop.permute.xlu0 %1081 }
 0x1c3   :  { %v1223_v38 = vsel %vm1219_vm5, %v1206_v34, %v1144_v35  ;;  %v1207_v39 = vsel %vm1202_vm4, %v1190_v33, %v1082_v36 }
 0x1c4   :  { %3897 = vmatmul.mubr.msk.f32.gmra.mxu0 %vm1247_vm6, %v1223_v38 }
 0x1c6   :  { %v1146_v40 = vpop.permute.xlu0 %1145  ;;  %v1084_v42 = vpop.permute.xlu1 %1083 }
 0x1c7   :  { %v1224_v43 = vsel %vm1219_vm5, %v1207_v39, %v1146_v40  ;;  %v1208_v44 = vsel %vm1202_vm4, %v1191_v37, %v1084_v42 }
 0x1c8   :  { %3899 = vmatprep.mubr.msk.f32.mxu0 %vm1247_vm6, %v1224_v43 }
 0x1ca   :  { %v1148_v46 = vpop.permute.xlu1 %1147  ;;  %v1086_v47 = vpop.permute.xlu0 %1085 }
 0x1cb   :  { %v1225_v48 = vsel %vm1219_vm5, %v1208_v44, %v1148_v46  ;;  %v1209_v50 = vsel %vm1202_vm4, %v1192_v41, %v1086_v47 }
 0x1cc   :  { %3900 = vmatmul.mubr.msk.f32.gmra.mxu0 %vm1247_vm6, %v1225_v48 }
 0x1ce   :  { %v1150_v51 = vpop.permute.xlu0 %1149  ;;  %v1088_v52 = vpop.permute.xlu1 %1087 }
 0x1cf   :  { %v1226_v54 = vsel %vm1219_vm5, %v1209_v50, %v1150_v51  ;;  %v1210_v55 = vsel %vm1202_vm4, %v1193_v45, %v1088_v52  ;;  %v5361_v51 = vld [vmem:[%s6115_s7] ss:$0 sm:$0xff] }
 0x1d0   :  { %3902 = vmatprep.mubr.msk.f32.mxu0 %vm1247_vm6, %v1226_v54 }
 0x1d2   :  { %v1152_v56 = vpop.permute.xlu1 %1151  ;;  %v1090_v58 = vpop.permute.xlu0 %1089 }
 0x1d3   :  { %v1227_v59 = vsel %vm1219_vm5, %v1210_v55, %v1152_v56  ;;  %v1211_v60 = vsel %vm1202_vm4, %v1194_v49, %v1090_v58 }
 0x1d4   :  { %3903 = vmatmul.mubr.msk.f32.gmra.mxu0 %vm1247_vm6, %v1227_v59 }
 0x1d6   :  { %v1154_v62 = vpop.permute.xlu0 %1153  ;;  %v1092_v0 = vpop.permute.xlu1 %1091 }
 0x1d7   :  { %v1228_v13 = vsel %vm1219_vm5, %v1211_v60, %v1154_v62  ;;  %v1212_v63 = vsel %vm1202_vm4, %v1195_v53, %v1092_v0 }
 0x1d8   :  { %3905 = vmatprep.mubr.msk.f32.mxu0 %vm1247_vm6, %v1228_v13 }
 0x1da   :  { %v1156_v14 = vpop.permute.xlu1 %1155  ;;  %v1094_v15 = vpop.permute.xlu0 %1093 }
 0x1db   :  { %v1229_v24 = vsel %vm1219_vm5, %v1212_v63, %v1156_v14  ;;  %v1213_v4 = vsel %vm1202_vm4, %v1196_v57, %v1094_v15 }
 0x1dc   :  { %3906 = vmatmul.mubr.msk.f32.gmra.mxu0 %vm1247_vm6, %v1229_v24 }
 0x1de   :  { %v1158_v16 = vpop.permute.xlu0 %1157  ;;  %v1096_v17 = vpop.permute.xlu1 %1095 }
 0x1df   :  { %v1230_v26 = vsel %vm1219_vm5, %v1213_v4, %v1158_v16  ;;  %v1214_v3 = vsel %vm1202_vm4, %v1197_v61, %v1096_v17 }
 0x1e0   :  { %3908 = vmatprep.mubr.msk.f32.mxu0 %vm1247_vm6, %v1230_v26 }
 0x1e2   :  { %v1160_v27 = vpop.permute.xlu1 %1159  ;;  %v1098_v18 = vpop.permute.xlu0 %1097 }
 0x1e3   :  { %v1231_v19 = vsel %vm1219_vm5, %v1214_v3, %v1160_v27  ;;  %v1215_v7 = vsel %vm1202_vm4, %v1198_v1, %v1098_v18 }
 0x1e4   :  { %3909 = vmatmul.mubr.msk.f32.gmra.mxu0 %vm1247_vm6, %v1231_v19 }
 0x1e6   :  { %v1162_v28 = vpop.permute.xlu0 %1161  ;;  %v1100_v20 = vpop.permute.xlu1 %1099 }
 0x1e7   :  { %v1232_v30 = vsel %vm1219_vm5, %v1215_v7, %v1162_v28  ;;  %v1216_v5 = vsel %vm1202_vm4, %v1199_v6, %v1100_v20 }
 0x1e8   :  { %3911 = vmatprep.mubr.msk.f32.mxu0 %vm1247_vm6, %v1232_v30 }
 0x1ea   :  { %v1164_v31 = vpop.permute.xlu1 %1163  ;;  %v1102_v32 = vpop.permute.xlu0 %1101 }
 0x1eb   :  { %v1233_v22 = vsel %vm1219_vm5, %v1216_v5, %v1164_v31  ;;  %v1217_v9 = vsel %vm1202_vm4, %v1200_v10, %v1102_v32  ;;  %v1462_v31 = vld [vmem:[%s6138_s26 + $0x8] sm:$0xff]  ;;  %v3605_v10 = vld [vmem:[%s6138_s26 + $0x30] sm:$0xff] }
 0x1ec   :  { %3912 = vmatmul.mubr.msk.f32.gmra.mxu0 %vm1247_vm6, %v1233_v22  ;;  %v3604_v32 = vld [vmem:[%s6138_s26 + $0x28] sm:$0xff]  ;;  %v1463_v22 = vld [vmem:[%s6138_s26 + $0x10] sm:$0xff] }
 0x1ee   :  { %v1166_v21 = vpop.permute.xlu0 %1165  ;;  %v1104_v34 = vpop.permute.xlu1 %1103 }
 0x1ef   :  { %v1234_v35 = vsel %vm1219_vm5, %v1217_v9, %v1166_v21  ;;  %v1218_v8 = vsel %vm1202_vm4, %v1201_v23, %v1104_v34  ;;  %v1464_v9 = vld [vmem:[%s6138_s26 + $0x18] sm:$0xff]  ;;  %v3607_v34 = vld [vmem:[%s6138_s26 + $0x40] sm:$0xff]  ;;  %v3608_v23 = vld [vmem:[%s6138_s26 + $0x48] sm:$0xff] }
 0x1f0   :  { %3914 = vmatprep.mubr.msk.f32.mxu0 %vm1247_vm6, %v1234_v35  ;;  %v3606_v21 = vld [vmem:[%s6138_s26 + $0x38] sm:$0xff]  ;;  %v3611_v35 = vld [vmem:[%s6138_s26 + $0x60] sm:$0xff] }
 0x1f2   :  { %v1168_v36 = vpop.permute.xlu1 %1167 }
 0x1f3   :  { %v1235_v38 = vsel %vm1219_vm5, %v1218_v8, %v1168_v36  ;;  %v3612_v8 = vld [vmem:[%s6138_s26 + $0x68] sm:$0xff]  ;;  %v3609_v36 = vld [vmem:[%s6138_s26 + $0x50] sm:$0xff] }
 0x1f4   :  { %3915 = vmatmul.mubr.msk.f32.gmra.mxu0 %vm1247_vm6, %v1235_v38  ;;  %v3613_v38 = vld [vmem:[%s6138_s26 + $0x70] sm:$0xff] }
 0x1f5   :  { %3987 = vmatprep.mubr.f32.mxu0 %v3603_v12  ;;  %v3614_v12 = vld [vmem:[%s6138_s26 + $0x78] sm:$0xff] }
 0x27c   :  { %v5348_v33 = vpop.f32.mrf.mxu0 }
 0x27d   :  { %v1372_v7 = vadd.f32 %v5348_v33, %v5361_v51 }
 0x27e   :  { %v5350_v29 = vpop.f32.mrf.mxu0 }
 0x27f   :  { %v1367_v20 = vadd.f32 %v5361_v51, %v5350_v29  ;;  %v5464_v6 = vmax.f32 %v1372_v7, 0.0  ;;  %v2260_v7 = vld [vmem:[%s6116_s8 + $0x40] sm:$0xff] }
 0x281   :  { %v5470_v5 = vmax.f32 %v1367_v20, 0.0 }
 0x284   :  { %v5352_v11 = vpop.f32.mrf.mxu0 }
 0x285   :  { %v1382_v27 = vadd.f32 %v5352_v11, %v5361_v51 }
 0x286   :  { %v5354_v39 = vpop.f32.mrf.mxu0 }
 0x287   :  { %v1377_v19 = vadd.f32 %v5361_v51, %v5354_v39  ;;  %v5450_v28 = vmax.f32 %v1382_v27, 0.0  ;;  %v3626_v27 = vld [vmem:[%s6139_s3 + $0x40] sm:$0x3] }
 0x289   :  { %v5458_v30 = vmax.f32 %v1377_v19, 0.0  ;;  %v2262_v19 = vld [vmem:[%s6116_s8 + $0x50] sm:$0xff] }
 0x28c   :  { %v3901_v40 = vpop.f32.mrf.mxu0 }
 0x28d   :  { %v1392_v17 = vadd.f32 %v3901_v40, %v5361_v51 }
 0x28e   :  { %v5356_v42 = vpop.f32.mrf.mxu0 }
 0x28f   :  { %v1387_v61 = vadd.f32 %v5361_v51, %v5356_v42  ;;  %v5434_v18 = vmax.f32 %v1392_v17, 0.0  ;;  %v3619_v17 = vld [vmem:[%s6139_s3 + $0x20] sm:$0xff] }
 0x291   :  { %v5442_v1 = vmax.f32 %v1387_v61, 0.0  ;;  %v3624_v61 = vld [vmem:[%s6139_s3 + $0x30] sm:$0xff] }
 0x294   :  { %v3904_v43 = vpop.f32.mrf.mxu0 }
 0x295   :  { %v1402_v24 = vadd.f32 %v3904_v43, %v5361_v51 }
 0x296   :  { %v1396_v37 = vpop.f32.mrf.mxu0 }
 0x297   :  { %v1397_v4 = vadd.f32 %v5361_v51, %v1396_v37  ;;  %v5418_v26 = vmax.f32 %v1402_v24, 0.0  ;;  %v3631_v24 = vld [vmem:[%s6139_s3 + $0x50] sm:$0xff] }
 0x299   :  { %v5426_v3 = vmax.f32 %v1397_v4, 0.0  ;;  %v3632_v4 = vld [vmem:[%s6139_s3 + $0x58] sm:$0x3] }
 0x29c   :  { %v3907_v44 = vpop.f32.mrf.mxu0 }
 0x29d   :  { %v1412_v53 = vadd.f32 %v3907_v44, %v5361_v51 }
 0x29e   :  { %v1406_v46 = vpop.f32.mrf.mxu0 }
 0x29f   :  { %v1407_v14 = vadd.f32 %v5361_v51, %v1406_v46  ;;  %v5404_v57 = vmax.f32 %v1412_v53, 0.0 }
 0x2a1   :  { %v5411_v16 = vmax.f32 %v1407_v14, 0.0  ;;  %v3630_v14 = vld [vmem:[%s6139_s3 + $0x48] sm:$0xff] }
 0x2a4   :  { %v3910_v47 = vpop.f32.mrf.mxu0 }
 0x2a5   :  { %v1422_v60 = vadd.f32 %v3910_v47, %v5361_v51 }
 0x2a6   :  { %v1416_v48 = vpop.f32.mrf.mxu0 }
 0x2a7   :  { %v1417_v0 = vadd.f32 %v5361_v51, %v1416_v48  ;;  %v5390_v63 = vmax.f32 %v1422_v60, 0.0 }
 0x2a9   :  { %v5397_v15 = vmax.f32 %v1417_v0, 0.0 }
 0x2ac   :  { %v3913_v41 = vpop.f32.mrf.mxu0 }
 0x2ad   :  { %v1432_v55 = vadd.f32 %v3913_v41, %v5361_v51 }
 0x2ae   :  { %v1426_v50 = vpop.f32.mrf.mxu0 }
 0x2af   :  { %v1427_v59 = vadd.f32 %v5361_v51, %v1426_v50  ;;  %v5376_v62 = vmax.f32 %v1432_v55, 0.0 }
 0x2b1   :  { %v5383_v13 = vmax.f32 %v1427_v59, 0.0 }
 0x2b4   :  { %v3916_v52 = vpop.f32.mrf.mxu0 }
 0x2b5   :  { %v1442_v54 = vadd.f32 %v3916_v52, %v5361_v51 }
 0x2b6   :  { %v1436_v45 = vpop.f32.mrf.mxu0 }
 0x2b7   :  { %v5365_v56 = vmax.f32 %v1442_v54, 0.0  ;;  %v1437_v58 = vadd.f32 %v5361_v51, %v1436_v45 }
 0x2b9   :  { %v5369_v49 = vmax.f32 %v1437_v58, 0.0  ;;  %3917 = vmatprep.subr.mxu1 %v5365_v56  ;;  %3955 = vmatprep.subr.mxu0 %v5365_v56 }
 0x2ba   :  { %3918 = vmatpush3.msra.mxu1 %v5365_v56  ;;  %3956 = vmatpush3.msra.mxu0 %v5365_v56 }
 0x2bb   :  { %3919 = vmatprep.subr.mxu1 %v5369_v49  ;;  %3957 = vmatprep.subr.mxu0 %v5369_v49 }
 0x2bc   :  { %3920 = vmatpush3.msra.mxu1 %v5369_v49  ;;  %3958 = vmatpush3.msra.mxu0 %v5369_v49 }
 0x2bd   :  { %3921 = vmatprep.subr.mxu1 %v5376_v62  ;;  %3959 = vmatprep.subr.mxu0 %v5376_v62 }
 0x2be   :  { %3922 = vmatpush3.msra.mxu1 %v5376_v62  ;;  %3960 = vmatpush3.msra.mxu0 %v5376_v62 }
 0x2bf   :  { %3923 = vmatprep.subr.mxu1 %v5383_v13  ;;  %3961 = vmatprep.subr.mxu0 %v5383_v13 }
 0x2c0   :  { %3924 = vmatpush3.msra.mxu1 %v5383_v13  ;;  %3962 = vmatpush3.msra.mxu0 %v5383_v13 }
 0x2c1   :  { %3925 = vmatprep.subr.mxu1 %v5390_v63  ;;  %3963 = vmatprep.subr.mxu0 %v5390_v63 }
 0x2c2   :  { %3926 = vmatpush3.msra.mxu1 %v5390_v63  ;;  %3964 = vmatpush3.msra.mxu0 %v5390_v63 }
 0x2c3   :  { %3927 = vmatprep.subr.mxu1 %v5397_v15  ;;  %3965 = vmatprep.subr.mxu0 %v5397_v15 }
 0x2c4   :  { %3928 = vmatpush3.msra.mxu1 %v5397_v15  ;;  %3966 = vmatpush3.msra.mxu0 %v5397_v15 }
 0x2c5   :  { %3929 = vmatprep.subr.mxu1 %v5404_v57  ;;  %3967 = vmatprep.subr.mxu0 %v5404_v57 }
 0x2c6   :  { %3930 = vmatpush3.msra.mxu1 %v5404_v57  ;;  %3968 = vmatpush3.msra.mxu0 %v5404_v57 }
 0x2c7   :  { %3931 = vmatprep.subr.mxu1 %v5411_v16  ;;  %3969 = vmatprep.subr.mxu0 %v5411_v16 }
 0x2c8   :  { %3932 = vmatpush3.msra.mxu1 %v5411_v16  ;;  %3970 = vmatpush3.msra.mxu0 %v5411_v16 }
 0x2c9   :  { %3933 = vmatprep.subr.mxu1 %v5418_v26  ;;  %3971 = vmatprep.subr.mxu0 %v5418_v26 }
 0x2ca   :  { %3934 = vmatpush3.msra.mxu1 %v5418_v26  ;;  %3972 = vmatpush3.msra.mxu0 %v5418_v26 }
 0x2cb   :  { %3935 = vmatprep.subr.mxu1 %v5426_v3  ;;  %3973 = vmatprep.subr.mxu0 %v5426_v3 }
 0x2cc   :  { %3936 = vmatpush3.msra.mxu1 %v5426_v3  ;;  %3974 = vmatpush3.msra.mxu0 %v5426_v3 }
 0x2cd   :  { %3937 = vmatprep.subr.mxu1 %v5434_v18  ;;  %3975 = vmatprep.subr.mxu0 %v5434_v18 }
 0x2ce   :  { %3938 = vmatpush3.msra.mxu1 %v5434_v18  ;;  %3976 = vmatpush3.msra.mxu0 %v5434_v18 }
 0x2cf   :  { %3939 = vmatprep.subr.mxu1 %v5442_v1  ;;  %3977 = vmatprep.subr.mxu0 %v5442_v1 }
 0x2d0   :  { %3940 = vmatpush3.msra.mxu1 %v5442_v1  ;;  %3978 = vmatpush3.msra.mxu0 %v5442_v1 }
 0x2d1   :  { %3941 = vmatprep.subr.mxu1 %v5450_v28  ;;  %3979 = vmatprep.subr.mxu0 %v5450_v28 }
 0x2d2   :  { %3942 = vmatpush3.msra.mxu1 %v5450_v28  ;;  %3980 = vmatpush3.msra.mxu0 %v5450_v28 }
 0x2d3   :  { %3943 = vmatprep.subr.mxu1 %v5458_v30  ;;  %3981 = vmatprep.subr.mxu0 %v5458_v30 }
 0x2d4   :  { %3944 = vmatpush3.msra.mxu1 %v5458_v30  ;;  %3982 = vmatpush3.msra.mxu0 %v5458_v30 }
 0x2d5   :  { %3945 = vmatprep.subr.mxu1 %v5464_v6  ;;  %3983 = vmatprep.subr.mxu0 %v5464_v6 }
 0x2d6   :  { %3946 = vmatpush3.msra.mxu1 %v5464_v6  ;;  %3984 = vmatpush3.msra.mxu0 %v5464_v6 }
 0x2d7   :  { %3947 = vmatprep.subr.mxu1 %v5470_v5  ;;  %3985 = vmatprep.subr.mxu0 %v5470_v5 }
 0x2d8   :  { %3948 = vmatpush3.msra.mxu1 %v5470_v5  ;;  %3986 = vmatpush3.msra.mxu0 %v5470_v5 }
 0x2d9   :  { %3993 = vmatprep.subr.mxu1 %v5365_v56  ;;  %4031 = vmatprep.subr.mxu0 %v5365_v56 }
 0x2da   :  { %3950 = vmatmul.mubr.f32.vlgmr.msra.gmra.mxu1 %v1462_v31  ;;  %3988 = vmatmul.mubr.f32.vlgmr.msra.gmra.mxu0 %v3604_v32 }
 0x2db   :  { %3994 = vmatpush3.msra.mxu1 %v5365_v56  ;;  %4032 = vmatpush3.msra.mxu0 %v5365_v56 }
 0x2dc   :  { %3995 = vmatprep.subr.mxu1 %v5369_v49  ;;  %4033 = vmatprep.subr.mxu0 %v5369_v49 }
 0x2dd   :  { %3996 = vmatpush3.msra.mxu1 %v5369_v49  ;;  %4034 = vmatpush3.msra.mxu0 %v5369_v49 }
 0x2de   :  { %3997 = vmatprep.subr.mxu1 %v5376_v62  ;;  %4035 = vmatprep.subr.mxu0 %v5376_v62 }
 0x2df   :  { %3998 = vmatpush3.msra.mxu1 %v5376_v62  ;;  %4036 = vmatpush3.msra.mxu0 %v5376_v62 }
 0x2e0   :  { %3999 = vmatprep.subr.mxu1 %v5383_v13  ;;  %4037 = vmatprep.subr.mxu0 %v5383_v13 }
 0x2e1   :  { %4000 = vmatpush3.msra.mxu1 %v5383_v13  ;;  %4038 = vmatpush3.msra.mxu0 %v5383_v13 }
 0x2e2   :  { %4001 = vmatprep.subr.mxu1 %v5390_v63  ;;  %4039 = vmatprep.subr.mxu0 %v5390_v63 }
 0x2e3   :  { %4002 = vmatpush3.msra.mxu1 %v5390_v63  ;;  %4040 = vmatpush3.msra.mxu0 %v5390_v63  ;;  %v1832_v63 = vld [vmem:[%s6139_s3] sm:$0xff] }
 0x2e4   :  { %4003 = vmatprep.subr.mxu1 %v5397_v15  ;;  %4041 = vmatprep.subr.mxu0 %v5397_v15 }
 0x2e5   :  { %4004 = vmatpush3.msra.mxu1 %v5397_v15  ;;  %4042 = vmatpush3.msra.mxu0 %v5397_v15  ;;  %v1833_v15 = vld [vmem:[%s6139_s3 + $0x8] sm:$0xff] }
 0x2e6   :  { %4005 = vmatprep.subr.mxu1 %v5404_v57  ;;  %4043 = vmatprep.subr.mxu0 %v5404_v57 }
 0x2e7   :  { %4006 = vmatpush3.msra.mxu1 %v5404_v57  ;;  %4044 = vmatpush3.msra.mxu0 %v5404_v57  ;;  %v1834_v57 = vld [vmem:[%s6139_s3 + $0x10] sm:$0x3] }
 0x2e8   :  { %4007 = vmatprep.subr.mxu1 %v5411_v16  ;;  %4045 = vmatprep.subr.mxu0 %v5411_v16 }
 0x2e9   :  { %4008 = vmatpush3.msra.mxu1 %v5411_v16  ;;  %4046 = vmatpush3.msra.mxu0 %v5411_v16  ;;  %v3618_v16 = vld [vmem:[%s6139_s3 + $0x18] sm:$0xff] }
 0x2ea   :  { %4009 = vmatprep.subr.mxu1 %v5418_v26  ;;  %4047 = vmatprep.subr.mxu0 %v5418_v26 }
 0x2eb   :  { %4010 = vmatpush3.msra.mxu1 %v5418_v26  ;;  %4048 = vmatpush3.msra.mxu0 %v5418_v26  ;;  %v3620_v26 = vld [vmem:[%s6139_s3 + $0x28] sm:$0x3] }
 0x2ec   :  { %4011 = vmatprep.subr.mxu1 %v5426_v3  ;;  %4049 = vmatprep.subr.mxu0 %v5426_v3 }
 0x2ed   :  { %4012 = vmatpush3.msra.mxu1 %v5426_v3  ;;  %4050 = vmatpush3.msra.mxu0 %v5426_v3  ;;  %v3625_v3 = vld [vmem:[%s6139_s3 + $0x38] sm:$0xff] }
 0x2ee   :  { %4013 = vmatprep.subr.mxu1 %v5434_v18  ;;  %4051 = vmatprep.subr.mxu0 %v5434_v18 }
 0x2ef   :  { %4014 = vmatpush3.msra.mxu1 %v5434_v18  ;;  %4052 = vmatpush3.msra.mxu0 %v5434_v18  ;;  %v2263_v18 = vld [vmem:[%s6116_s8 + $0x58] sm:$0xff] }
 0x2f0   :  { %4015 = vmatprep.subr.mxu1 %v5442_v1  ;;  %4053 = vmatprep.subr.mxu0 %v5442_v1 }
 0x2f1   :  { %4016 = vmatpush3.msra.mxu1 %v5442_v1  ;;  %4054 = vmatpush3.msra.mxu0 %v5442_v1  ;;  %v2261_v1 = vld [vmem:[%s6116_s8 + $0x48] sm:$0xff] }
 0x2f2   :  { %4017 = vmatprep.subr.mxu1 %v5450_v28  ;;  %4055 = vmatprep.subr.mxu0 %v5450_v28 }
 0x2f3   :  { %4018 = vmatpush3.msra.mxu1 %v5450_v28  ;;  %4056 = vmatpush3.msra.mxu0 %v5450_v28  ;;  %v2259_v28 = vld [vmem:[%s6116_s8 + $0x38] sm:$0xff] }
 0x2f4   :  { %4019 = vmatprep.subr.mxu1 %v5458_v30  ;;  %4057 = vmatprep.subr.mxu0 %v5458_v30 }
 0x2f5   :  { %3952 = vmatprep.mubr.f32.mxu1 %v1463_v22  ;;  %3990 = vmatprep.mubr.f32.mxu0 %v3605_v10  ;;  %v2256_v10 = vld [vmem:[%s6116_s8 + $0x20] sm:$0xff] }
 0x2f6   :  { %4020 = vmatpush3.msra.mxu1 %v5458_v30  ;;  %4058 = vmatpush3.msra.mxu0 %v5458_v30  ;;  %v2258_v30 = vld [vmem:[%s6116_s8 + $0x30] sm:$0xff] }
 0x2f7   :  { %3953 = vmatmul.mubr.f32.gmra.mxu1 %v1464_v9  ;;  %3991 = vmatmul.mubr.f32.gmra.mxu0 %v3606_v21  ;;  %v2255_v9 = vld [vmem:[%s6116_s8 + $0x18] sm:$0xff] }
 0x2f8   :  { %4021 = vmatprep.subr.mxu1 %v5464_v6  ;;  %4059 = vmatprep.subr.mxu0 %v5464_v6 }
 0x2f9   :  { %4022 = vmatpush3.msra.mxu1 %v5464_v6  ;;  %4060 = vmatpush3.msra.mxu0 %v5464_v6  ;;  %v2257_v6 = vld [vmem:[%s6116_s8 + $0x28] sm:$0xff] }
 0x2fa   :  { %4023 = vmatprep.subr.mxu1 %v5470_v5  ;;  %4061 = vmatprep.subr.mxu0 %v5470_v5 }
 0x2fb   :  { %4024 = vmatpush3.msra.mxu1 %v5470_v5  ;;  %4025 = vmatprep.mubr.f32.mxu1 %v3607_v34 }
 0x2fc   :  { %4062 = vmatpush3.msra.mxu0 %v5470_v5  ;;  %4063 = vmatprep.mubr.f32.mxu0 %v3611_v35  ;;  %v2254_v35 = vld [vmem:[%s6116_s8 + $0x10] sm:$0xff] }
 0x2fd   :  { %4026 = vmatmul.mubr.f32.vlgmr.msra.gmra.mxu1 %v3608_v23  ;;  %4064 = vmatmul.mubr.f32.vlgmr.msra.gmra.mxu0 %v3612_v8 }
 0x2fe   :  { %4028 = vmatprep.mubr.f32.mxu1 %v3609_v36  ;;  %4066 = vmatprep.mubr.f32.mxu0 %v3613_v38  ;;  %v2253_v36 = vld [vmem:[%s6116_s8 + $0x8] sm:$0xff] }
 0x2ff   :  { %4069 = vmatprep.subr.mxu1 %v4309_v2  ;;  %4120 = vmatprep.subr.mxu0 %v4309_v2 }
 0x301   :  { %4029 = vmatmul.mubr.f32.gmra.mxu1 %v3610_v25  ;;  %4067 = vmatmul.mubr.f32.gmra.mxu0 %v3614_v12 }
 0x302   :  { %4077 = vmatprep.mubr.msk.f32.mxu1 %vm4313_vm7, %v4309_v2  ;;  %4128 = vmatprep.mubr.msk.f32.mxu0 %vm4313_vm7, %v4309_v2 }
 0x39a   :  { %v3951_v33 = vpop.f32.mrf.mxu1  ;;  %v3989_v29 = vpop.f32.mrf.mxu0 }
 0x39b   :  { %v1821_v49 = vmax.f32 %v3951_v33, %v3989_v29  ;;  %v2252_v29 = vld [vmem:[%s6116_s8] sm:$0xff]  ;;  %s4319_s8 = smov 64  }
 0x39c   :  { %v1531_v11 = vpop.f32.mrf.mxu1  ;;  %v1621_v39 = vpop.f32.mrf.mxu0 }
 0x39d   :  { %v1820_v0 = vmax.f32 %v1531_v11, %v1621_v39 }
 0x3b7   :  { %v3954_v40 = vpop.f32.mrf.mxu1  ;;  %v3992_v42 = vpop.f32.mrf.mxu0 }
 0x3b8   :  { %v1823_v51 = vmax.f32 %v3954_v40, %v3992_v42 }
 0x3b9   :  { %v1541_v43 = vpop.f32.mrf.mxu1  ;;  %v1631_v37 = vpop.f32.mrf.mxu0 }
 0x3ba   :  { %v1822_v55 = vmax.f32 %v1541_v43, %v1631_v37 }
 0x3bd   :  { %v4027_v44 = vpop.f32.mrf.mxu1  ;;  %v4065_v46 = vpop.f32.mrf.mxu0 }
 0x3be   :  { %v1825_v56 = vmax.f32 %v4027_v44, %v4065_v46 }
 0x3bf   :  { %v1711_v47 = vpop.f32.mrf.mxu1  ;;  %v1801_v48 = vpop.f32.mrf.mxu0 }
 0x3c0   :  { %v1824_v60 = vmax.f32 %v1711_v47, %v1801_v48  ;;  %v1829_v13 = vmax.f32 %v1821_v49, %v1825_v56 }
 0x3c1   :  { %v4030_v41 = vpop.f32.mrf.mxu1  ;;  %v4068_v50 = vpop.f32.mrf.mxu0 }
 0x3c2   :  { %v1827_v52 = vmax.f32 %v4030_v41, %v4068_v50  ;;  %v1828_v53 = vmax.f32 %v1820_v0, %v1824_v60 }
 0x3c3   :  { %v1721_v54 = vpop.f32.mrf.mxu1  ;;  %v1811_v45 = vpop.f32.mrf.mxu0 }
 0x3c4   :  { %v1831_v58 = vmax.f32 %v1823_v51, %v1827_v52  ;;  %v1826_v59 = vmax.f32 %v1721_v54, %v1811_v45 }
 0x3c6   :  { %v1830_v62 = vmax.f32 %v1822_v55, %v1826_v59  ;;  %4070 = vmatpush3.msra.mxu1 %v1831_v58  ;;  %4121 = vmatpush3.msra.mxu0 %v1831_v58 }
 0x3c7   :  { %4071 = vmatprep.subr.mxu1 %v4309_v2  ;;  %4122 = vmatprep.subr.mxu0 %v4309_v2 }
 0x3c8   :  { %4072 = vmatpush3.msra.mxu1 %v1830_v62  ;;  %4123 = vmatpush3.msra.mxu0 %v1830_v62 }
 0x3c9   :  { %4073 = vmatprep.subr.mxu1 %v4309_v2  ;;  %4124 = vmatprep.subr.mxu0 %v4309_v2 }
 0x3ca   :  { %4074 = vmatpush3.msra.mxu1 %v1829_v13  ;;  %4125 = vmatpush3.msra.mxu0 %v1829_v13 }
 0x3cb   :  { %4075 = vmatprep.subr.mxu1 %v4309_v2  ;;  %4126 = vmatprep.subr.mxu0 %v4309_v2 }
 0x3cc   :  { %4076 = vmatpush3.msra.mxu1 %v1828_v53  ;;  %4127 = vmatpush3.msra.mxu0 %v1828_v53 }
 0x3cd   :  { %4078 = vmatmul.mubr.msk.f32.vlgmr.msra.gmra.mxu1 %vm1835_vm8, %v1832_v63  ;;  %4086 = vmatprep.subr.mxu1 %v4309_v2 }
 0x3ce   :  { %4087 = vmatpush3.msra.mxu1 %v1831_v58  ;;  %4080 = vmatprep.mubr.msk.f32.mxu1 %vm4313_vm7, %v4309_v2 }
 0x3cf   :  { %4088 = vmatprep.subr.mxu1 %v4309_v2  ;;  %4129 = vmatmul.mubr.msk.f32.vlgmr.msra.gmra.mxu0 %vm1835_vm8, %v3630_v14 }
 0x3d0   :  { %4089 = vmatpush3.msra.mxu1 %v1830_v62  ;;  %4131 = vmatprep.mubr.msk.f32.mxu0 %vm4313_vm7, %v4309_v2 }
 0x3d1   :  { %4081 = vmatmul.mubr.msk.f32.gmra.mxu1 %vm1835_vm8, %v1833_v15  ;;  %4090 = vmatprep.subr.mxu1 %v4309_v2 }
 0x3d2   :  { %4091 = vmatpush3.msra.mxu1 %v1829_v13  ;;  %4083 = vmatprep.mubr.msk.f32.mxu1 %vm4313_vm7, %v4309_v2 }
 0x3d3   :  { %4092 = vmatprep.subr.mxu1 %v4309_v2  ;;  %4132 = vmatmul.mubr.msk.f32.gmra.mxu0 %vm1835_vm8, %v3631_v24 }
 0x3d4   :  { %4093 = vmatpush3.msra.mxu1 %v1828_v53  ;;  %4134 = vmatprep.mubr.msk.f32.mxu0 %vm4313_vm7, %v4309_v2 }
 0x3d5   :  { %4084 = vmatmul.mubr.msk.f32.gmra.mxu1 %vm1835_vm8, %v1834_v57  ;;  %4103 = vmatprep.subr.mxu1 %v4309_v2 }
 0x3d6   :  { %4094 = vmatprep.mubr.msk.f32.mxu1 %vm4313_vm7, %v4309_v2  ;;  %4170 = vmatprep.subr.mxu0 %v4309_v2 }
 0x3d7   :  { %4135 = vmatmul.mubr.msk.f32.gmra.mxu0 %vm1835_vm8, %v3632_v4 }
 0x3d8   :  { %4176 = vmatprep.mubr.msk.f32.mxu0 %vm4313_vm7, %v4309_v2 }
 0x3d9   :  { %4095 = vmatmul.mubr.msk.f32.vlgmr.msra.gmra.mxu1 %vm1835_vm8, %v3618_v16 }
 0x3da   :  { %4104 = vmatpush3.msra.mxu1 %v1831_v58  ;;  %4097 = vmatprep.mubr.msk.f32.mxu1 %vm4313_vm7, %v4309_v2 }
 0x3db   :  { %4105 = vmatprep.subr.mxu1 %v4309_v2 }
 0x3dc   :  { %4106 = vmatpush3.msra.mxu1 %v1830_v62 }
 0x3dd   :  { %4107 = vmatprep.subr.mxu1 %v4309_v2  ;;  %4098 = vmatmul.mubr.msk.f32.gmra.mxu1 %vm1835_vm8, %v3619_v17  ;;  %v3636_v17 = vld [vmem:[%s6117_s9] ss:$0 sm:$0xff] }
 0x3de   :  { %4108 = vmatpush3.msra.mxu1 %v1829_v13  ;;  %4100 = vmatprep.mubr.msk.f32.mxu1 %vm4313_vm7, %v4309_v2 }
 0x3df   :  { %4109 = vmatprep.subr.mxu1 %v4309_v2 }
 0x3e0   :  { %4110 = vmatpush3.msra.mxu1 %v1828_v53 }
 0x3e1   :  { %4101 = vmatmul.mubr.msk.f32.gmra.mxu1 %vm1835_vm8, %v3620_v26  ;;  %4137 = vmatprep.subr.mxu1 %v4309_v2 }
 0x3e2   :  { %4111 = vmatprep.mubr.msk.f32.mxu1 %vm4313_vm7, %v4309_v2 }
 0x3e5   :  { %4112 = vmatmul.mubr.msk.f32.vlgmr.msra.gmra.mxu1 %vm1835_vm8, %v3624_v61 }
 0x3e6   :  { %4114 = vmatprep.mubr.msk.f32.mxu1 %vm4313_vm7, %v4309_v2  ;;  %4138 = vmatpush3.msra.mxu1 %v2263_v18 }
 0x3e7   :  { %4139 = vmatprep.subr.mxu1 %v4309_v2 }
 0x3e8   :  { %4140 = vmatpush3.msra.mxu1 %v2262_v19 }
 0x3e9   :  { %4115 = vmatmul.mubr.msk.f32.gmra.mxu1 %vm1835_vm8, %v3625_v3  ;;  %4141 = vmatprep.subr.mxu1 %v4309_v2 }
 0x3ea   :  { %4117 = vmatprep.mubr.msk.f32.mxu1 %vm4313_vm7, %v4309_v2  ;;  %4142 = vmatpush3.msra.mxu1 %v2261_v1 }
 0x3eb   :  { %4143 = vmatprep.subr.mxu1 %v4309_v2 }
 0x3ec   :  { %4144 = vmatpush3.msra.mxu1 %v2260_v7 }
 0x3ed   :  { %4118 = vmatmul.mubr.msk.f32.gmra.mxu1 %vm1835_vm8, %v3626_v27  ;;  %4145 = vmatprep.subr.mxu1 %v4309_v2 }
 0x3ee   :  { %4161 = vmatprep.mubr.msk.f32.mxu1 %vm4313_vm7, %v4309_v2  ;;  %4146 = vmatpush3.msra.mxu1 %v2259_v28  ;;  %v2364_v28 = vld [vmem:[%s6112_s4] sm:$0xff] }
 0x3ef   :  { %4147 = vmatprep.subr.mxu1 %v4309_v2 }
 0x3f0   :  { %4148 = vmatpush3.msra.mxu1 %v2258_v30  ;;  %v3642_v30 = vld [vmem:[%s6112_s4 + $0x8] sm:$0xff] }
 0x3f1   :  { %4149 = vmatprep.subr.mxu1 %v4309_v2 }
 0x3f2   :  { %4150 = vmatpush3.msra.mxu1 %v2257_v6  ;;  %v3645_v6 = vld [vmem:[%s6112_s4 + $0x10] sm:$0xff] }
 0x3f3   :  { %4151 = vmatprep.subr.mxu1 %v4309_v2 }
 0x3f4   :  { %4152 = vmatpush3.msra.mxu1 %v2256_v10  ;;  %v2694_v10 = vld [vmem:[%s6118_s10 + $0x58] sm:$0xff] }
 0x3f5   :  { %4153 = vmatprep.subr.mxu1 %v4309_v2 }
 0x3f6   :  { %4154 = vmatpush3.msra.mxu1 %v2255_v9  ;;  %v2693_v9 = vld [vmem:[%s6118_s10 + $0x50] sm:$0xff] }
 0x3f7   :  { %4155 = vmatprep.subr.mxu1 %v4309_v2 }
 0x3f8   :  { %4156 = vmatpush3.msra.mxu1 %v2254_v35  ;;  %v2690_v35 = vld [vmem:[%s6118_s10 + $0x38] sm:$0xff] }
 0x3f9   :  { %4157 = vmatprep.subr.mxu1 %v4309_v2 }
 0x3fa   :  { %4158 = vmatpush3.msra.mxu1 %v2253_v36  ;;  %v2687_v36 = vld [vmem:[%s6118_s10 + $0x20] sm:$0xff] }
 0x3fb   :  { %4159 = vmatprep.subr.mxu1 %v4309_v2 }
 0x3fc   :  { %4160 = vmatpush3.msra.mxu1 %v2252_v29  ;;  %v2706_v29 = vld [vmem:[%s6118_s10 + $0xb8] sm:$0xff] }
 0x3fd   :  { %4197 = vmatprep.subr.mxu1 %v4309_v2 }
 0x48d   :  { %v5700_v20 = vpop.f32.mrf.mxu1 }
 0x48f   :  { %v4079_v5 = vpop.f32.mrf.mxu1  ;;  %v2190_v31 = vpop.f32.mrf.mxu0 }
 0x490   :  { %2231 = vrot.lane.b32.xlu0 %v2190_v31, %s4314_s28  ;;  %v2698_v5 = vld [vmem:[%s6118_s10 + $0x78] sm:$0xff]  ;;  %v2697_v31 = vld [vmem:[%s6118_s10 + $0x70] sm:$0xff] }
 0x491   :  { %v1916_v32 = vpop.f32.mrf.mxu1  ;;  %v4130_v22 = vpop.f32.mrf.mxu0 }
 0x492   :  { %v2695_v22 = vld [vmem:[%s6118_s10 + $0x60] sm:$0xff] }
 0x493   :  { %v4082_v21 = vpop.f32.mrf.mxu1  ;;  %v2195_v34 = vpop.f32.mrf.mxu0 }
 0x494   :  { %v2692_v21 = vld [vmem:[%s6118_s10 + $0x48] sm:$0xff] }
 0x495   :  { %v1921_v23 = vpop.f32.mrf.mxu1  ;;  %v4133_v8 = vpop.f32.mrf.mxu0 }
 0x496   :  { %v2688_v8 = vld [vmem:[%s6118_s10 + $0x28] sm:$0xff] }
 0x497   :  { %v4085_v38 = vpop.f32.mrf.mxu1  ;;  %v2200_v25 = vpop.f32.mrf.mxu0 }
 0x498   :  { %v2686_v38 = vld [vmem:[%s6118_s10 + $0x18] sm:$0xff] }
 0x499   :  { %v2004_v12 = vpop.f32.mrf.mxu1  ;;  %v4136_v33 = vpop.f32.mrf.mxu0 }
 0x49a   :  { %2207 = vrot.lane.b32.xlu0 %v2004_v12, %s4315_s1  ;;  %v2684_v12 = vld [vmem:[%s6118_s10 + $0x8] sm:$0xff]  ;;  %v2683_v33 = vld [vmem:[%s6118_s10] sm:$0xff] }
 0x49b   :  { %v4096_v11 = vpop.f32.mrf.mxu1 }
 0x49c   :  { %v2705_v11 = vld [vmem:[%s6118_s10 + $0xb0] sm:$0xff] }
 0x49d   :  { %v2009_v39 = vpop.f32.mrf.mxu1 }
 0x49e   :  { %2209 = vrot.lane.b32.xlu1 %v2009_v39, %s4315_s1  ;;  %v2704_v39 = vld [vmem:[%s6118_s10 + $0xa8] sm:$0xff] }
 0x49f   :  { %v4099_v40 = vpop.f32.mrf.mxu1 }
 0x4a0   :  { %v2703_v40 = vld [vmem:[%s6118_s10 + $0xa0] sm:$0xff] }
 0x4a1   :  { %v2014_v42 = vpop.f32.mrf.mxu1 }
 0x4a3   :  { %v4102_v43 = vpop.f32.mrf.mxu1 }
 0x4a4   :  { %v2701_v43 = vld [vmem:[%s6118_s10 + $0x90] sm:$0xff] }
 0x4a5   :  { %v2097_v37 = vpop.f32.mrf.mxu1 }
 0x4a6   :  { %2219 = vrot.lane.b32.xlu1 %v2097_v37, %s4316_s23  ;;  %v2700_v37 = vld [vmem:[%s6118_s10 + $0x88] sm:$0xff] }
 0x4a7   :  { %v4113_v44 = vpop.f32.mrf.mxu1 }
 0x4a9   :  { %v2102_v46 = vpop.f32.mrf.mxu1 }
 0x4aa   :  { %2221 = vrot.lane.b32.xlu0 %v2102_v46, %s4316_s23  ;;  %2233 = vrot.lane.b32.xlu1 %v2195_v34, %s4314_s28  ;;  %v2691_v34 = vld [vmem:[%s6118_s10 + $0x40] sm:$0xff] }
 0x4ab   :  { %v4116_v47 = vpop.f32.mrf.mxu1  ;;  %v2699_v46 = vld [vmem:[%s6118_s10 + $0x80] sm:$0xff] }
 0x4ad   :  { %v2107_v48 = vpop.f32.mrf.mxu1 }
 0x4ae   :  { %2211 = vrot.lane.b32.xlu0 %v2014_v42, %s4315_s1  ;;  %2223 = vrot.lane.b32.xlu1 %v2107_v48, %s4316_s23  ;;  %v2702_v42 = vld [vmem:[%s6118_s10 + $0x98] sm:$0xff] }
 0x4af   :  { %v4119_v41 = vpop.f32.mrf.mxu1 }
 0x4b2   :  { %2235 = vrot.lane.b32.xlu0 %v2200_v25, %s4314_s28  ;;  %v2685_v25 = vld [vmem:[%s6118_s10 + $0x10] sm:$0xff] }
 0x502   :  { %v2232_v50 = vpop.permute.xlu0 %2231 }
 0x50c   :  { %v2208_v52 = vpop.permute.xlu0 %2207 }
 0x50d   :  { %v2241_v54 = vsel %vm2240_vm9, %v5700_v20, %v2208_v52  ;;  %v3648_v20 = vld [vmem:[%s6112_s4 + $0x18] sm:$0xff] }
 0x510   :  { %v2210_v51 = vpop.permute.xlu1 %2209 }
 0x511   :  { %v2242_v58 = vsel %vm2240_vm9, %v1916_v32, %v2210_v51  ;;  %v2696_v32 = vld [vmem:[%s6118_s10 + $0x68] sm:$0xff] }
 0x518   :  { %v2220_v45 = vpop.permute.xlu1 %2219 }
 0x519   :  { %v2245_v55 = vsel %vm2244_vm10, %v2241_v54, %v2220_v45 }
 0x51a   :  { %v2249_v56 = vsel %vm2248_vm11, %v2245_v55, %v2232_v50 }
 0x51b   :  { %4162 = vmatmul.mubr.msk.f32.vlgmr.msra.gmra.mxu1 %vm2271_vm12, %v2249_v56 }
 0x51c   :  { %v2222_v59 = vpop.permute.xlu0 %2221  ;;  %v2234_v49 = vpop.permute.xlu1 %2233  ;;  %4164 = vmatprep.mubr.msk.f32.mxu1 %vm4313_vm7, %v4309_v2 }
 0x51d   :  { %v2246_v60 = vsel %vm2244_vm10, %v2242_v58, %v2222_v59 }
 0x51e   :  { %v2250_v62 = vsel %vm2248_vm11, %v2246_v60, %v2234_v49  ;;  %v3651_v60 = vld [vmem:[%s6119_s11] ss:$0 sm:$0xff] }
 0x51f   :  { %4165 = vmatmul.mubr.msk.f32.gmra.mxu1 %vm2271_vm12, %v2250_v62 }
 0x520   :  { %v2212_v0 = vpop.permute.xlu0 %2211  ;;  %4167 = vmatprep.mubr.msk.f32.mxu1 %vm4313_vm7, %v4309_v2  ;;  %v2224_v53 = vpop.permute.xlu1 %2223 }
 0x521   :  { %v2243_v13 = vsel %vm2240_vm9, %v1921_v23, %v2212_v0  ;;  %v2689_v23 = vld [vmem:[%s6118_s10 + $0x30] sm:$0xff] }
 0x522   :  { %v2247_v63 = vsel %vm2244_vm10, %v2243_v13, %v2224_v53 }
 0x524   :  { %v2236_v14 = vpop.permute.xlu0 %2235 }
 0x525   :  { %v2251_v15 = vsel %vm2248_vm11, %v2247_v63, %v2236_v14  ;;  %v2789_v63 = vld [vmem:[%s6113_s5] sm:$0x3]  ;;  %v3654_v14 = vld [vmem:[%s6113_s5 + $0x2] sm:$0x3] }
 0x526   :  { %4168 = vmatmul.mubr.msk.f32.gmra.mxu1 %vm2271_vm12, %v2251_v15  ;;  %v3656_v15 = vld [vmem:[%s6113_s5 + $0x4] sm:$0x3] }
 0x527   :  { %4203 = vmatprep.mubr.msk.f32.mxu1 %vm4313_vm7, %v4309_v2 }
 0x5db   :  { %v2347_v24 = vpop.f32.mrf.mxu1 }
 0x5dc   :  { %v2348_v18 = vadd.f32 %v3636_v17, %v2347_v24  ;;  %v3658_v24 = vld [vmem:[%s6113_s5 + $0x6] sm:$0x3] }
 0x5dd   :  { %v4163_v57 = vpop.f32.mrf.mxu1 }
 0x5de   :  { %v2361_v7 = vmax.f32 %v2348_v18, 0.0  ;;  %v3130_v57 = vld [vmem:[%s6120_s12 + $0xf8] sm:$0xff] }
 0x5df   :  { %v2352_v4 = vpop.f32.mrf.mxu1  ;;  %v3126_v18 = vld [vmem:[%s6120_s12 + $0xd8] sm:$0xff] }
 0x5e0   :  { %v2353_v61 = vadd.f32 %v3636_v17, %v2352_v4  ;;  %v3114_v4 = vld [vmem:[%s6120_s12 + $0x78] sm:$0xff] }
 0x5e1   :  { %v4166_v16 = vpop.f32.mrf.mxu1 }
 0x5e2   :  { %v2362_v1 = vmax.f32 %v2353_v61, 0.0  ;;  %v3129_v16 = vld [vmem:[%s6120_s12 + $0xf0] sm:$0xff]  ;;  %v3112_v61 = vld [vmem:[%s6120_s12 + $0x68] sm:$0xff] }
 0x5e6   :  { %v2357_v26 = vpop.f32.mrf.mxu1 }
 0x5e7   :  { %v2358_v3 = vadd.f32 %v3636_v17, %v2357_v26  ;;  %v3113_v17 = vld [vmem:[%s6120_s12 + $0x70] sm:$0xff]  ;;  %v3128_v26 = vld [vmem:[%s6120_s12 + $0xe8] sm:$0xff] }
 0x5e8   :  { %v4169_v27 = vpop.f32.mrf.mxu1 }
 0x5e9   :  { %v2363_v19 = vmax.f32 %v2358_v3, 0.0  ;;  %v3127_v3 = vld [vmem:[%s6120_s12 + $0xe0] sm:$0xff] }
 0x5ea   :  { %v3111_v27 = vld [vmem:[%s6120_s12 + $0x60] sm:$0xff] }
 0x5eb   :  { %4171 = vmatpush3.msk.msra.mxu0 %vm166_vm0, %v2363_v19  ;;  %4198 = vmatpush3.msk.msra.mxu1 %vm166_vm0, %v2363_v19 }
 0x5ec   :  { %4172 = vmatprep.subr.mxu0 %v4309_v2  ;;  %4199 = vmatprep.subr.mxu1 %v4309_v2 }
 0x5ed   :  { %4173 = vmatpush3.msra.mxu0 %v2362_v1  ;;  %4200 = vmatpush3.msra.mxu1 %v2362_v1 }
 0x5ee   :  { %4174 = vmatprep.subr.mxu0 %v4309_v2  ;;  %4201 = vmatprep.subr.mxu1 %v4309_v2 }
 0x5ef   :  { %4175 = vmatpush3.msra.mxu0 %v2361_v7  ;;  %4202 = vmatpush3.msra.mxu1 %v2361_v7 }
 0x5f0   :  { %4179 = vmatprep.subr.mxu0 %v4309_v2  ;;  %4177 = vmatmul.mubr.msk.f32.vlgmr.msra.gmra.mxu0 %vm2365_vm13, %v2364_v28  ;;  %v3124_v28 = vld [vmem:[%s6120_s12 + $0xc8] sm:$0xff] }
 0x5f1   :  { %4180 = vmatpush3.msk.msra.mxu0 %vm166_vm0, %v2363_v19  ;;  %4185 = vmatprep.mubr.msk.f32.mxu0 %vm4313_vm7, %v4309_v2 }
 0x5f2   :  { %4181 = vmatprep.subr.mxu0 %v4309_v2  ;;  %4204 = vmatmul.mubr.msk.f32.vlgmr.msra.gmra.mxu1 %vm2365_vm13, %v3648_v20  ;;  %v3108_v20 = vld [vmem:[%s6120_s12 + $0x48] sm:$0xff] }
 0x5f3   :  { %4182 = vmatpush3.msra.mxu0 %v2362_v1  ;;  %4206 = vmatprep.subr.mxu1 %v4309_v2 }
 0x5f4   :  { %4183 = vmatprep.subr.mxu0 %v4309_v2  ;;  %4208 = vmatprep.mubr.msk.f32.mxu1 %vm4313_vm7, %v4309_v2 }
 0x5f5   :  { %4184 = vmatpush3.msra.mxu0 %v2361_v7 }
 0x5f6   :  { %4186 = vmatmul.mubr.msk.f32.vlgmr.msra.gmra.mxu0 %vm2365_vm13, %v3642_v30  ;;  %4188 = vmatprep.subr.mxu0 %v4309_v2  ;;  %v3123_v30 = vld [vmem:[%s6120_s12 + $0xc0] sm:$0xff] }
 0x5f7   :  { %4189 = vmatpush3.msk.msra.mxu0 %vm166_vm0, %v2363_v19  ;;  %4194 = vmatprep.mubr.msk.f32.mxu0 %vm4313_vm7, %v4309_v2  ;;  %vm2790_vm0 = vcmask 64512   ;;  %v3110_v19 = vld [vmem:[%s6120_s12 + $0x58] sm:$0xff] }
 0x5f8   :  { %4190 = vmatprep.subr.mxu0 %v4309_v2 }
 0x5f9   :  { %4191 = vmatpush3.msra.mxu0 %v2362_v1  ;;  %v3125_v1 = vld [vmem:[%s6120_s12 + $0xd0] sm:$0xff] }
 0x5fa   :  { %4192 = vmatprep.subr.mxu0 %v4309_v2 }
 0x5fb   :  { %4193 = vmatpush3.msra.mxu0 %v2361_v7  ;;  %v3109_v7 = vld [vmem:[%s6120_s12 + $0x50] sm:$0xff] }
 0x5fc   :  { %4195 = vmatmul.mubr.msk.f32.vlgmr.msra.gmra.mxu0 %vm2365_vm13, %v3645_v6  ;;  %2718 = vmatprep.subr.mxu0 %v4309_v2  ;;  %v3107_v6 = vld [vmem:[%s6120_s12 + $0x40] sm:$0xff] }
 0x5fd   :  { %2719 = vmatpush1.msra.mxu0 %v2698_v5  ;;  %v3122_v5 = vld [vmem:[%s6120_s12 + $0xb8] sm:$0xff] }
 0x5fe   :  { %2720 = vmatprep.subr.mxu0 %v4309_v2 }
 0x5ff   :  { %2721 = vmatpush1.msra.mxu0 %v2697_v31  ;;  %v3106_v31 = vld [vmem:[%s6120_s12 + $0x38] sm:$0xff] }
 0x600   :  { %2722 = vmatprep.subr.mxu0 %v4309_v2 }
 0x601   :  { %2723 = vmatpush1.msra.mxu0 %v2696_v32  ;;  %v3121_v32 = vld [vmem:[%s6120_s12 + $0xb0] sm:$0xff] }
 0x602   :  { %2724 = vmatprep.subr.mxu0 %v4309_v2 }
 0x603   :  { %2725 = vmatpush1.msra.mxu0 %v2695_v22  ;;  %v3105_v22 = vld [vmem:[%s6120_s12 + $0x30] sm:$0xff] }
 0x604   :  { %2726 = vmatprep.subr.mxu0 %v4309_v2 }
 0x605   :  { %2727 = vmatpush1.msra.mxu0 %v2694_v10  ;;  %v3120_v10 = vld [vmem:[%s6120_s12 + $0xa8] sm:$0xff] }
 0x606   :  { %2728 = vmatprep.subr.mxu0 %v4309_v2 }
 0x607   :  { %2729 = vmatpush1.msra.mxu0 %v2693_v9  ;;  %v3104_v9 = vld [vmem:[%s6120_s12 + $0x28] sm:$0xff] }
 0x608   :  { %2730 = vmatprep.subr.mxu0 %v4309_v2 }
 0x609   :  { %2731 = vmatpush1.msra.mxu0 %v2692_v21  ;;  %v3119_v21 = vld [vmem:[%s6120_s12 + $0xa0] sm:$0xff] }
 0x60a   :  { %2732 = vmatprep.subr.mxu0 %v4309_v2 }
 0x60b   :  { %2733 = vmatpush1.msra.mxu0 %v2691_v34  ;;  %v3103_v34 = vld [vmem:[%s6120_s12 + $0x20] sm:$0xff] }
 0x60c   :  { %2734 = vmatprep.subr.mxu0 %v4309_v2 }
 0x60d   :  { %2735 = vmatpush1.msra.mxu0 %v2690_v35  ;;  %v3118_v35 = vld [vmem:[%s6120_s12 + $0x98] sm:$0xff] }
 0x60e   :  { %2736 = vmatprep.subr.mxu0 %v4309_v2 }
 0x60f   :  { %2737 = vmatpush1.msra.mxu0 %v2689_v23  ;;  %v3102_v23 = vld [vmem:[%s6120_s12 + $0x18] sm:$0xff] }
 0x610   :  { %2738 = vmatprep.subr.mxu0 %v4309_v2 }
 0x611   :  { %2739 = vmatpush1.msra.mxu0 %v2688_v8  ;;  %v3117_v8 = vld [vmem:[%s6120_s12 + $0x90] sm:$0xff] }
 0x612   :  { %2740 = vmatprep.subr.mxu0 %v4309_v2 }
 0x613   :  { %2741 = vmatpush1.msra.mxu0 %v2687_v36  ;;  %v3101_v36 = vld [vmem:[%s6120_s12 + $0x10] sm:$0xff] }
 0x614   :  { %2742 = vmatprep.subr.mxu0 %v4309_v2 }
 0x615   :  { %2743 = vmatpush1.msra.mxu0 %v2686_v38 }
 0x616   :  { %2744 = vmatprep.subr.mxu0 %v4309_v2 }
 0x617   :  { %2745 = vmatpush1.msra.mxu0 %v2685_v25 }
 0x618   :  { %2746 = vmatprep.subr.mxu0 %v4309_v2 }
 0x619   :  { %2747 = vmatpush1.msra.mxu0 %v2684_v12  ;;  %v3116_v12 = vld [vmem:[%s6120_s12 + $0x88] sm:$0xff] }
 0x61a   :  { %2748 = vmatprep.subr.mxu0 %v4309_v2 }
 0x61b   :  { %2749 = vmatpush1.msra.mxu0 %v2683_v33  ;;  %v3100_v33 = vld [vmem:[%s6120_s12 + $0x8] sm:$0xff] }
 0x61c   :  { %2766 = vmatprep.subr.mxu0 %v4309_v2 }
 0x61d   :  { %2767 = vmatpush2.msra.mxu0 %v2706_v29  ;;  %v3115_v29 = vld [vmem:[%s6120_s12 + $0x80] sm:$0xff] }
 0x61e   :  { %2768 = vmatprep.subr.mxu0 %v4309_v2 }
 0x61f   :  { %2769 = vmatpush2.msra.mxu0 %v2705_v11  ;;  %v3099_v11 = vld [vmem:[%s6120_s12] sm:$0xff] }
 0x620   :  { %2770 = vmatprep.subr.mxu0 %v4309_v2 }
 0x621   :  { %2771 = vmatpush2.msra.mxu0 %v2704_v39 }
 0x622   :  { %2772 = vmatprep.subr.mxu0 %v4309_v2 }
 0x623   :  { %2773 = vmatpush2.msra.mxu0 %v2703_v40 }
 0x624   :  { %2774 = vmatprep.subr.mxu0 %v4309_v2 }
 0x625   :  { %2775 = vmatpush2.msra.mxu0 %v2702_v42 }
 0x626   :  { %2776 = vmatprep.subr.mxu0 %v4309_v2 }
 0x627   :  { %2777 = vmatpush2.msra.mxu0 %v2701_v43 }
 0x628   :  { %2778 = vmatprep.subr.mxu0 %v4309_v2 }
 0x629   :  { %2779 = vmatpush2.msra.mxu0 %v2700_v37 }
 0x62a   :  { %2780 = vmatprep.subr.mxu0 %v4309_v2 }
 0x62b   :  { %2781 = vmatpush2.msra.mxu0 %v2699_v46 }
 0x62c   :  { %4226 = vmatprep.subr.mxu0 %v4309_v2 }
 0x6b0   :  { %v2438_v44 = vpop.f32.mrf.mxu0 }
 0x6b2   :  { %v4178_v47 = vpop.f32.mrf.mxu0  ;;  %v2663_v48 = vpop.f32.mrf.mxu1 }
 0x6b4   :  { %v4205_v41 = vpop.f32.mrf.mxu1 }
 0x6b6   :  { %v2513_v50 = vpop.f32.mrf.mxu0 }
 0x6b7   :  { %2668 = vrot.lane.b32.xlu1 %v2513_v50, %s4316_s23 }
 0x6b8   :  { %v4187_v51 = vpop.f32.mrf.mxu0 }
 0x6bb   :  { %2676 = vrot.lane.b32.xlu1 %v2663_v48, %s4317_s2 }
 0x6bc   :  { %v2588_v52 = vpop.f32.mrf.mxu0 }
 0x6bd   :  { %2672 = vrot.lane.b32.xlu0 %v2588_v52, %s4318_s17  ;;  %v3216_v52 = vld [vmem:[%s6122_s14 + $0x38] sm:$0xff] }
 0x6be   :  { %v4196_v54 = vpop.f32.mrf.mxu0 }
 0x6bf   :  { %v3215_v54 = vld [vmem:[%s6122_s14 + $0x30] sm:$0xff] }
 0x729   :  { %v2669_v45 = vpop.permute.xlu1 %2668 }
 0x72a   :  { %v2679_v56 = vsel %vm2244_vm10, %v2438_v44, %v2669_v45  ;;  %v3214_v45 = vld [vmem:[%s6122_s14 + $0x28] sm:$0xff] }
 0x72d   :  { %v2677_v55 = vpop.permute.xlu1 %2676 }
 0x72f   :  { %v2673_v58 = vpop.permute.xlu0 %2672 }
 0x730   :  { %v2680_v59 = vsel %vm2271_vm12, %v2679_v56, %v2673_v58  ;;  %v2682_v49 = vsel %vm2681_vm14, %v2673_v58, %v2677_v55  ;;  %v3213_v55 = vld [vmem:[%s6122_s14 + $0x20] sm:$0xff]  ;;  %v3212_v56 = vld [vmem:[%s6122_s14 + $0x18] sm:$0xff]  ;;  %v3211_v58 = vld [vmem:[%s6122_s14 + $0x10] sm:$0xff] }
 0x731   :  { %3652 = vmatprep.mubr.msk.f32.mxu0 %vm2714_vm15, %v2682_v49  ;;  %v3209_v49 = vld [vmem:[%s6122_s14] sm:$0xff] }
 0x732   :  { %2783 = vmatmul.mubr.f32.vlgmr.msra.gmra.mxu0 %v2680_v59  ;;  %v3210_v59 = vld [vmem:[%s6122_s14 + $0x8] sm:$0xff] }
 0x733   :  { %4242 = vmatprep.mubr.msk.f32.mxu0 %vm4313_vm7, %v4309_v2  ;;  %4227 = vmatpush3.msra.mxu0 %v3216_v52 }
 0x734   :  { %4228 = vmatprep.subr.mxu0 %v4309_v2 }
 0x735   :  { %4229 = vmatpush3.msra.mxu0 %v3215_v54 }
 0x736   :  { %4230 = vmatprep.subr.mxu0 %v4309_v2 }
 0x737   :  { %4231 = vmatpush3.msra.mxu0 %v3214_v45 }
 0x738   :  { %4232 = vmatprep.subr.mxu0 %v4309_v2 }
 0x739   :  { %4233 = vmatpush3.msra.mxu0 %v3213_v55 }
 0x73a   :  { %4234 = vmatprep.subr.mxu0 %v4309_v2 }
 0x73b   :  { %4235 = vmatpush3.msra.mxu0 %v3212_v56 }
 0x73c   :  { %4236 = vmatprep.subr.mxu0 %v4309_v2 }
 0x73d   :  { %4237 = vmatpush3.msra.mxu0 %v3211_v58 }
 0x73e   :  { %4238 = vmatprep.subr.mxu0 %v4309_v2 }
 0x73f   :  { %4239 = vmatpush3.msra.mxu0 %v3210_v59 }
 0x740   :  { %4240 = vmatprep.subr.mxu0 %v4309_v2 }
 0x741   :  { %4241 = vmatpush3.msra.mxu0 %v3209_v49 }
 0x7f2   :  { %v2784_v62 = vpop.f32.mrf.mxu0 }
 0x7f3   :  { %v2785_v0 = vadd.f32 %v3651_v60, %v2784_v62  ;;  %v3319_v60 = vld [vmem:[%s6124_s16 + $0x38] sm:$0xff]  ;;  %v3318_v62 = vld [vmem:[%s6124_s16 + $0x30] sm:$0xff] }
 0x7f4   :  { %v2786_v13 = vpop.f32.mrf.mxu0 }
 0x7f5   :  { %v2788_v53 = vmax.f32 %v2785_v0, 0.0  ;;  %v3317_v0 = vld [vmem:[%s6124_s16 + $0x28] sm:$0xff]  ;;  %v3316_v13 = vld [vmem:[%s6124_s16 + $0x20] sm:$0xff] }
 0x7f7   :  { %4207 = vmatpush3.msra.mxu1 %v2788_v53 }
 0x7f8   :  { %4209 = vmatmul.mubr.msk.f32.vlgmr.msra.gmra.mxu1 %vm2790_vm0, %v2789_v63  ;;  %4211 = vmatprep.subr.mxu1 %v4309_v2  ;;  %v3314_v63 = vld [vmem:[%s6124_s16 + $0x10] sm:$0xff] }
 0x7f9   :  { %4212 = vmatpush3.msra.mxu1 %v2788_v53  ;;  %4213 = vmatprep.mubr.msk.f32.mxu1 %vm4313_vm7, %v4309_v2 }
 0x7fa   :  { %4216 = vmatprep.subr.mxu1 %v4309_v2 }
 0x7fc   :  { %4214 = vmatmul.mubr.msk.f32.vlgmr.msra.gmra.mxu1 %vm2790_vm0, %v3654_v14  ;;  %v3313_v14 = vld [vmem:[%s6124_s16 + $0x8] sm:$0xff] }
 0x7fd   :  { %4217 = vmatpush3.msra.mxu1 %v2788_v53  ;;  %4218 = vmatprep.mubr.msk.f32.mxu1 %vm4313_vm7, %v4309_v2 }
 0x7fe   :  { %4221 = vmatprep.subr.mxu1 %v4309_v2 }
 0x800   :  { %4219 = vmatmul.mubr.msk.f32.vlgmr.msra.gmra.mxu1 %vm2790_vm0, %v3656_v15  ;;  %v3312_v15 = vld [vmem:[%s6124_s16] sm:$0xff] }
 0x801   :  { %4222 = vmatpush3.msra.mxu1 %v2788_v53  ;;  %4223 = vmatprep.mubr.msk.f32.mxu1 %vm4313_vm7, %v4309_v2  ;;  %v3315_v53 = vld [vmem:[%s6124_s16 + $0x18] sm:$0xff] }
 0x802   :  { %3832 = vmatprep.subr.mxu1 %v3130_v57  ;;  %v3660_v57 = vld [vmem:[%s6121_s13] ss:$0 sm:$0xff] }
 0x804   :  { %4224 = vmatmul.mubr.msk.f32.vlgmr.msra.gmra.mxu1 %vm2790_vm0, %v3658_v24 }
 0x805   :  { %3833 = vmatpush3.msra.mxu1 %v3114_v4 }
 0x806   :  { %3834 = vmatprep.subr.mxu1 %v3129_v16 }
 0x807   :  { %3835 = vmatpush3.msra.mxu1 %v3113_v17 }
 0x808   :  { %3836 = vmatprep.subr.mxu1 %v3128_v26 }
 0x809   :  { %3837 = vmatpush3.msra.mxu1 %v3112_v61 }
 0x80a   :  { %3838 = vmatprep.subr.mxu1 %v3127_v3 }
 0x80b   :  { %3839 = vmatpush3.msra.mxu1 %v3111_v27 }
 0x80c   :  { %3840 = vmatprep.subr.mxu1 %v3126_v18 }
 0x80d   :  { %3841 = vmatpush3.msra.mxu1 %v3110_v19 }
 0x80e   :  { %3842 = vmatprep.subr.mxu1 %v3125_v1  ;;  %v3663_v1 = vld [vmem:[#allocation2] ss:$0 sm:$0xff] }
 0x80f   :  { %3843 = vmatpush3.msra.mxu1 %v3109_v7 }
 0x810   :  { %3844 = vmatprep.subr.mxu1 %v3124_v28 }
 0x811   :  { %3845 = vmatpush3.msra.mxu1 %v3108_v20 }
 0x812   :  { %3846 = vmatprep.subr.mxu1 %v3123_v30 }
 0x813   :  { %3847 = vmatpush3.msra.mxu1 %v3107_v6 }
 0x814   :  { %3848 = vmatprep.subr.mxu1 %v3122_v5 }
 0x815   :  { %3849 = vmatpush3.msra.mxu1 %v3106_v31 }
 0x816   :  { %3850 = vmatprep.subr.mxu1 %v3121_v32 }
 0x817   :  { %3851 = vmatpush3.msra.mxu1 %v3105_v22 }
 0x818   :  { %3852 = vmatprep.subr.mxu1 %v3120_v10 }
 0x819   :  { %3853 = vmatpush3.msra.mxu1 %v3104_v9 }
 0x81a   :  { %3854 = vmatprep.subr.mxu1 %v3119_v21 }
 0x81b   :  { %3855 = vmatpush3.msra.mxu1 %v3103_v34 }
 0x81c   :  { %3856 = vmatprep.subr.mxu1 %v3118_v35 }
 0x81d   :  { %3857 = vmatpush3.msra.mxu1 %v3102_v23 }
 0x81e   :  { %3858 = vmatprep.subr.mxu1 %v3117_v8 }
 0x81f   :  { %3859 = vmatpush3.msra.mxu1 %v3101_v36 }
 0x820   :  { %3860 = vmatprep.subr.mxu1 %v3116_v12 }
 0x821   :  { %3861 = vmatpush3.msra.mxu1 %v3100_v33 }
 0x822   :  { %3862 = vmatprep.subr.mxu1 %v3115_v29 }
 0x823   :  { %3863 = vmatpush3.msra.mxu1 %v3099_v11 }
 0x824   :  { %4245 = vmatprep.subr.mxu1 %v4309_v2 }
 0x8b8   :  { %v2860_v38 = vpop.f32.mrf.mxu1 }
 0x8ba   :  { %v4210_v25 = vpop.f32.mrf.mxu1 }
 0x8bc   :  { %v2935_v39 = vpop.f32.mrf.mxu1 }
 0x8be   :  { %v4215_v40 = vpop.f32.mrf.mxu1 }
 0x8c0   :  { %v3010_v42 = vpop.f32.mrf.mxu1 }
 0x8c2   :  { %v4220_v43 = vpop.f32.mrf.mxu1 }
 0x8c4   :  { %v3085_v37 = vpop.f32.mrf.mxu1 }
 0x8c5   :  { %v4276_v44 = vpack.i.bf16 %v2935_v39, %v3085_v37 }
 0x8c6   :  { %v4225_v46 = vpop.f32.mrf.mxu1 }
 0x8c7   :  { %4277 = vrot.lane.b32.xlu0 %v4276_v44, %s4319_s8 }
 0x939   :  { %v4278_v47 = vpop.permute.xlu0 %4277 }
 0x93a   :  { %v4280_v48 = vunpack.i.h.bf16 %v4278_v47  ;;  %v4279_v41 = vunpack.i.l.bf16 %v4278_v47 }
 0x93c   :  { %v3098_v50 = vsel %vm2714_vm15, %v3010_v42, %v4279_v41  ;;  %v3097_v51 = vsel %vm2714_vm15, %v2860_v38, %v4280_v48 }
 0x93d   :  { %3202 = vmatprep.mubr.f32.mxu1 %v3098_v50 }
 0x93e   :  { %3203 = vmatmul.mubr.f32.vlgmr.msra.gmra.mxu1 %v3097_v51 }
 0x93f   :  { %4261 = vmatprep.mubr.msk.f32.mxu1 %vm4313_vm7, %v4309_v2  ;;  %4246 = vmatpush3.msra.mxu1 %v3319_v60 }
 0x940   :  { %4247 = vmatprep.subr.mxu1 %v4309_v2 }
 0x941   :  { %4248 = vmatpush3.msra.mxu1 %v3318_v62 }
 0x942   :  { %4249 = vmatprep.subr.mxu1 %v4309_v2 }
 0x943   :  { %4250 = vmatpush3.msra.mxu1 %v3317_v0 }
 0x944   :  { %4251 = vmatprep.subr.mxu1 %v4309_v2 }
 0x945   :  { %4252 = vmatpush3.msra.mxu1 %v3316_v13 }
 0x946   :  { %4253 = vmatprep.subr.mxu1 %v4309_v2 }
 0x947   :  { %4254 = vmatpush3.msra.mxu1 %v3315_v53 }
 0x948   :  { %4255 = vmatprep.subr.mxu1 %v4309_v2 }
 0x949   :  { %4256 = vmatpush3.msra.mxu1 %v3314_v63 }
 0x94a   :  { %4257 = vmatprep.subr.mxu1 %v4309_v2 }
 0x94b   :  { %4258 = vmatpush3.msra.mxu1 %v3313_v14 }
 0x94c   :  { %4259 = vmatprep.subr.mxu1 %v4309_v2  ;;  %v3661_v2 = vld [vmem:[%s6123_s15] ss:$0 sm:$0xff]  ;;  %s4320_s15 = smov [#allocation3]  }
 0x94d   :  { %4260 = vmatpush3.msra.mxu1 %v3312_v15  ;;  %s3409_s0 = sshll.u32 %s4320_s15, 4  ;;  %s3410_s0 = int_to_ptr.vmem [resolvable:$true] %s3409_s0 }
 0x94e   :  { %p4292_p1 = scmp.lt.s32.totalorder %s3410_s0, %s3410_s0 }
 0x9fe   :  { %v3864_v24 = vpop.f32.mrf.mxu1 }
 0xa00   :  { %v3865_v4 = vpop.f32.mrf.mxu1 }
 0xa01   :  { %v3866_v16 = vadd.f32 %v3865_v4, %v3864_v24 }
 0xa03   :  { %v3205_v17 = vadd.f32 %v3866_v16, %v3660_v57 }
 0xa05   :  { %4281 = vtanh.f32 %v3205_v17 }
 0xa12   :  { %v4282_v26 = vpop.eup %4281 }
 0xa13   :  { %3327 = vrot.lane.b32.xlu1 %v4282_v26, %s4319_s8  ;;  %4243 = vmatmul.mubr.msk.f32.vlgmr.msra.gmra.mxu0 %vm2714_vm15, %v4282_v26 }
 0xa85   :  { %v3328_v61 = vpop.permute.xlu1 %3327 }
 0xa86   :  { %4262 = vmatmul.mubr.msk.f32.vlgmr.msra.gmra.mxu1 %vm2714_vm15, %v3328_v61 }
 0xad3   :  { %v3293_v3 = vpop.f32.mrf.mxu0 }
 0xad4   :  { %v3294_v27 = vadd.f32 %v3661_v2, %v3293_v3 }
 0xad5   :  { %v4244_v18 = vpop.f32.mrf.mxu0 }
 0xad6   :  { %v3298_v19 = vsel %vm3297_vm1, %v3294_v27, -inf }
 0xad7   :  { %3299 = vmax.xlane.f32.xlu0 %v3298_v19 }
 0xb46   :  { %v3397_v7 = vpop.f32.mrf.mxu1 }
 0xb47   :  { %v3398_v28 = vadd.f32 %v3663_v1, %v3397_v7 }
 0xb48   :  { %v4263_v20 = vpop.f32.mrf.mxu1 }
 0xb49   :  { %3402 = vst.msk [vmem:[%s6127_s19] sm:$0x3] %vm3401_vm2, %v3398_v28  ;;  %s4287_s19 = scalar_lea.vmem %s3410_s0, 32 }
 0xb4a   :  { %p4288_p0 = scmp.ne.s32.totalorder %s3410_s0, %s4287_s19  ;;  %p4293_p2 = scmp.lt.s32.totalorder %s4287_s19, %s4287_s19 }
 0xb4c   :  { %p4294_p3 = por %p4293_p2, %p4292_p1 }
 0xb4e   :  { %p4295_p4 = pnand %p4294_p3, %p4288_p0 }
 0xb60   :  { %v3300_v30 = vpop.xlane.xlu0 %3299 }
 0xb61   :  { %v3301_v6 = vsub.f32 %v3294_v27, %v3300_v30 }
 0xb63   :  { %v3302_v5 = vmul.f32 1.442695, %v3301_v6 }
 0xb65   :  { %4283 = vpow2.f32 %v3302_v5 }
 0xb72   :  { %v4284_v31 = vpop.eup %4283 }
 0xb73   :  { %v3304_v32 = vsel %vm3297_vm1, %v4284_v31, 0.0 }
 0xb74   :  { %3305 = vadd.xlane.f32.xlu1 %v3304_v32 }
 0xbfd   :  { %v3306_v22 = vpop.xlane.xlu1 %3305 }
 0xbfe   :  { %4285 = vlog2.f32 %v3306_v22 }
 0xc0b   :  { %v4286_v10 = vpop.eup %4285 }
 0xc0c   :  { %v3308_v9 = vmul.f32 0.6931472, %v4286_v10 }
 0xc0e   :  { %v3309_v21 = vadd.f32 %v3308_v9, %v3300_v30 }
 0xc10   :  { %v3310_v34 = vsub.f32 %v3294_v27, %v3309_v21 }
 0xc12   :  { %3311 = vst.msk [vmem:[#allocation3] sm:$0x3] %vm3297_vm1, %v3310_v34 }
 0xc13   :  { %4298 = shalt.err (!%p4295_p4)
}
 0xc14   :  { %3412 = dma.vmem_to_hbm [thread:$0]  %s3410_s0, 32, %s6126_s18, [#allocation4]  }
 0xc15   :  { %4307 = dma.done.wait [#allocation4], 32  }
 0xc16   :  { %4308 = vsyncadd [#allocation4], 4294967264 }
 0xc17   :  { %3420 = vsyncpa [#allocation4], 1 }

</bundles_post_ra>
